<compile_context>
chip_gen: v5e
topology: v5e:2x2
jax: 0.10.0
libtpu: 0.0.40
codegen_flags: <defaults>
</compile_context>

<pallas_src>
import functools

import numpy as np
import jax
import jax.numpy as jnp
from jax import lax
from jax.experimental import pallas as pl
from jax.experimental.pallas import tpu as pltpu


def _dis_final_block_kernel(x_ref, addmap_ref, w1_ref, w2_ref, b2_ref, w3_ref, b3_ref,
                            o_ref, acc_scr, h1_scr, *, n_tile, hw, cin, cmid, slope):
    # ---- conv_1 (3x3, pad=1): in-kernel im2col as 9 accumulated MXU matmuls -------------
    # x_ref is the padded slab (6, 6, n_tile, Cin).  Tap (kh, kw) contributes
    # x[kh+hh, kw+ww, n, :] @ w1[kh, kw] to output pixel hw = hh*4 + ww; the zero padding
    # handles the borders.  Accumulator rows are ordered (hw, n_local); the leading-dim
    # flatten below is layout-free because n_tile is always a multiple of 8.
    for t in range(9):
        kh, kw = t // 3, t % 3
        xt = x_ref[kh:kh + 4, kw:kw + 4, :, :].reshape(hw * n_tile, cin)
        d = jnp.dot(xt, w1_ref[t], preferred_element_type=jnp.float32)
        if t == 0:
            acc_scr[...] = d
        else:
            acc_scr[...] += d

    # ---- per-pixel epilogue (b1 + v*kmap + LeakyReLU) and relayout into the
    # (n_tile, HW*Cmid) slab consumed by conv_2.  Cheap VPU ops + aligned slice stores.
    for k in range(hw):
        tap = acc_scr[k * n_tile:(k + 1) * n_tile, :] + addmap_ref[k:k + 1, :]
        tap = jnp.where(tap >= 0, tap, slope * tap)          # LeakyReLU(0.2)
        h1_scr[:, k * cmid:(k + 1) * cmid] = tap.astype(h1_scr.dtype)

    # ---- conv_2 (4x4 'valid' -> 1x1 spatial): ONE matmul with K = HW*Cmid ---------------
    h2 = jnp.dot(h1_scr[...], w2_ref[...],
                 preferred_element_type=jnp.float32) + b2_ref[...]     # (n_tile, Cout)
    h2 = jnp.where(h2 >= 0, h2, slope * h2)                  # LeakyReLU(0.2)

    # ---- conv_3 (1x1 -> 1 channel), lane-dense: (1, Cout) x (n_tile, Cout)^T ------------
    # Transposed-B contraction puts the batch in lanes, so the output block is a dense
    # (1, n_tile) row instead of a masked 1-lane-wide column.
    o_row = lax.dot_general(w3_ref[...], h2, (((1,), (1,)), ((), ())),
                            preferred_element_type=jnp.float32) + b3_ref[...]
    o_ref[...] = o_row.reshape(1, 1, n_tile)


def _round_up(x, m):
    return ((x + m - 1) // m) * m


def _vmem_capacity_bytes():
    try:
        return int(pltpu.get_tpu_info().vmem_capacity_bytes)
    except Exception:
        return 64 << 20                                      # v7x-safe default


def _has_multiple_tensorcores():
    # Best-effort: only used to prefer a >=2-step grid (megacore); falling back to False
    # just keeps the single-TC tile choice, which is safe everywhere.
    try:
        info = pltpu.get_tpu_info()
        for name in ("num_cores", "core_count", "num_tensorcores", "tensorcore_count"):
            v = getattr(info, name, None)
            if isinstance(v, int) and v > 1:
                return True
    except Exception:
        pass
    try:
        kind = jax.devices()[0].device_kind.lower()
        return ("v7" in kind) or ("v4" in kind) or ("v5p" in kind)
    except Exception:
        return False


def _tile_vmem_bytes(t, cin, cmid_p, cout, hw, mm_item):
    """Per-grid-step VMEM footprint estimate (double-buffered I/O + resident weights)."""
    x_block = 36 * t * cin * mm_item                         # padded activation tile
    out_block = t * 4
    weights = (9 * cin * cmid_p * mm_item                    # w1 taps
               + hw * cmid_p * 4                             # addmap (f32)
               + hw * cmid_p * cout * mm_item                # w2 flat
               + (2 * cout + 1) * 4)                         # b2, w3, b3
    scratch = hw * t * cmid_p * 4 + t * hw * cmid_p * mm_item  # acc_scr + h1_scr
    temps = hw * t * cin * mm_item + 2 * t * cout * 4          # tap slice + h2/out temps
    # Constant-index_map weights are budgeted x2 (no pl.Buffered(1), see TODO below).
    return 2 * (x_block + out_block) + 2 * weights + scratch + temps


def _pick_batch_tile(n, fits, prefer_two_blocks):
    n8 = max(8, _round_up(n, 8))
    cands = [t for t in (128, 64, 32, 16, 8) if t <= n8] or [8]
    ok = [t for t in cands if fits(t)] or [8]
    if prefer_two_blocks:
        two = [t for t in ok if -(-n8 // t) >= 2]            # ceil(n8/t) >= 2 grid steps
        if two:
            ok = two
    return max(ok)


def dis_final_block_forward(x_nchw, params, *, matmul_dtype=jnp.bfloat16):
    """Pallas implementation of DisFinalBlock.forward (x: NCHW, H=W=4)."""
    w1, b1, w2, b2, w3, b3 = params                          # effective (eql-scaled) OIHW
    N, C, H, W = x_nchw.shape
    assert H == 4 and W == 4, "conv_2 is a 4x4 'valid' conv -> spatial must be 4x4"
    Cmid = w1.shape[0]
    Cout = w2.shape[0]
    HW = H * W
    Cmid_p = _round_up(Cmid, 128)                            # lane-aligned stores / conv_2 K
    mm_item = np.dtype(matmul_dtype).itemsize

    vmem_cap = _vmem_capacity_bytes()
    vmem_budget = max(24 << 20, int(vmem_cap * 0.85))
    fits = lambda t: _tile_vmem_bytes(t, C, Cmid_p, Cout, HW, mm_item) + (4 << 20) <= vmem_budget
    n_tile = _pick_batch_tile(N, fits, _has_multiple_tensorcores())
    N_pad = _round_up(max(N, n_tile), n_tile)                # zero-pad batch to the tile
    num_blocks = N_pad // n_tile

    x = x_nchw.astype(jnp.float32)

    # ---- MinibatchStdDev scalar (real batch only, computed before padding) -------------
    mu = jnp.mean(x, axis=0, keepdims=True)
    std = jnp.sqrt(jnp.mean((x - mu) ** 2, axis=0) + 1e-8)
    v = jnp.mean(std)

    # ---- padded activation slab for in-kernel im2col: (6, 6, N_pad, C), channels minor.
    # HW-major layout makes per-tap rows land in (hw, n_local) order inside the kernel
    # with a layout-free leading-dim flatten (no in-kernel relayout).
    x_hwnc = jnp.transpose(x, (2, 3, 0, 1))                  # (H, W, N, C)
    x_pad = jnp.pad(x_hwnc, ((1, 1), (1, 1), (0, N_pad - N), (0, 0))).astype(matmul_dtype)

    # ---- conv_1 weights: per-tap matmul weights + stddev-channel additive map ----------
    w1_taps = jnp.transpose(w1[:, :C, :, :], (2, 3, 1, 0)).reshape(9, C, Cmid)
    w1_taps = jnp.pad(w1_taps, ((0, 0), (0, 0), (0, Cmid_p - Cmid))).astype(matmul_dtype)
    kmap4 = lax.conv_general_dilated(                        # per-pixel stddev-channel sum
        jnp.ones((1, 1, H, W), jnp.float32), w1[:, C:C + 1, :, :],
        (1, 1), ((1, 1), (1, 1)), dimension_numbers=('NCHW', 'OIHW', 'NCHW'))
    kmap = jnp.transpose(kmap4[0], (1, 2, 0)).reshape(HW, Cmid)
    addmap = b1[None, :].astype(jnp.float32) + v * kmap      # b1 + v*kmap folded together
    addmap = jnp.pad(addmap, ((0, 0), (0, Cmid_p - Cmid)))

    # ---- conv_2 as one (HW*Cmid_p, Cout) matmul weight; conv_3 as a (1, Cout) row -------
    w2_flat = jnp.transpose(w2, (2, 3, 1, 0))                # (4, 4, Cmid, Cout)
    w2_flat = jnp.pad(w2_flat, ((0, 0), (0, 0), (0, Cmid_p - Cmid), (0, 0)))
    w2_flat = w2_flat.reshape(HW * Cmid_p, Cout).astype(matmul_dtype)
    w3_row = w3.reshape(1, Cout).astype(jnp.float32)

    est = _tile_vmem_bytes(n_tile, C, Cmid_p, Cout, HW, mm_item)
    vmem_limit = int(min(vmem_budget, max(est + (8 << 20), 32 << 20)))

    kernel = functools.partial(_dis_final_block_kernel, n_tile=n_tile, hw=HW,
                               cin=C, cmid=Cmid_p, slope=0.2)
    # TODO(synk): mark the constant-index_map weight specs below with
    # pipeline_mode=pl.Buffered(1) once single-buffered resident operands are reliably
    # supported by the top-level pallas_call pipeline; tile selection above already
    # budgets them double-buffered, so they fit v7x's 64 MiB either way.
    out = pl.pallas_call(
        kernel,
        out_shape=jax.ShapeDtypeStruct((num_blocks, 1, n_tile), jnp.float32),
        grid=(num_blocks,),
        in_specs=[
            pl.BlockSpec((6, 6, n_tile, C), lambda i: (0, 0, i, 0)),      # padded activations
            pl.BlockSpec((HW, Cmid_p), lambda i: (0, 0)),                 # addmap (resident)
            pl.BlockSpec((9, C, Cmid_p), lambda i: (0, 0, 0)),            # w1 taps (resident)
            pl.BlockSpec((HW * Cmid_p, Cout), lambda i: (0, 0)),          # w2 flat (resident)
            pl.BlockSpec((1, Cout), lambda i: (0, 0)),                    # b2
            pl.BlockSpec((1, Cout), lambda i: (0, 0)),                    # w3
            pl.BlockSpec((1, 1), lambda i: (0, 0)),                       # b3
        ],
        out_specs=pl.BlockSpec((1, 1, n_tile), lambda i: (i, 0, 0)),      # lane-dense rows
        scratch_shapes=[pltpu.VMEM((HW * n_tile, Cmid_p), jnp.float32),   # conv_1 accumulator
                        pltpu.VMEM((n_tile, HW * Cmid_p), matmul_dtype)], # conv_2 LHS slab
        compiler_params=pltpu.CompilerParams(
            dimension_semantics=("parallel",),
            vmem_limit_bytes=vmem_limit),
    )(x_pad, addmap,
      w1_taps, w2_flat, b2.reshape(1, Cout).astype(jnp.float32),
      w3_row, b3.reshape(1, 1).astype(jnp.float32))
    return out.reshape(-1)[:N]                               # matches y.view(-1)


def init_params(key, in_channels, out_channels, use_eql=True):
    """Deterministic synthetic parameters (shapes from DisFinalBlock.__init__)."""
    ks = jax.random.split(key, 6)
    w1 = jax.random.normal(ks[0], (in_channels, in_channels + 1, 3, 3), jnp.float32)
    b1 = jax.random.normal(ks[1], (in_channels,), jnp.float32) * 0.1
    w2 = jax.random.normal(ks[2], (out_channels, in_channels, 4, 4), jnp.float32)
    b2 = jax.random.normal(ks[3], (out_channels,), jnp.float32) * 0.1
    w3 = jax.random.normal(ks[4], (1, out_channels, 1, 1), jnp.float32)
    b3 = jax.random.normal(ks[5], (1,), jnp.float32) * 0.1
    if use_eql:
        # EqualizedConv2d forward-time scale: sqrt(2 / fan_in), fan_in = kh*kw*cin
        w1 = w1 * np.sqrt(2.0 / ((in_channels + 1) * 9))
        w2 = w2 * np.sqrt(2.0 / (in_channels * 16))
        w3 = w3 * np.sqrt(2.0 / (out_channels * 1))
    return (w1, b1, w2, b2, w3, b3)


def ref_forward(x, params):
    """Pure-JAX reference mirroring the PyTorch forward exactly (NCHW)."""
    w1, b1, w2, b2, w3, b3 = params
    N, C, H, W = x.shape
    mu = jnp.mean(x, axis=0, keepdims=True)
    std = jnp.sqrt(jnp.mean((x - mu) ** 2, axis=0) + 1e-8)
    v = jnp.mean(std)
    y = jnp.concatenate([x, jnp.full((N, 1, H, W), v, x.dtype)], axis=1)
    dn = ('NCHW', 'OIHW', 'NCHW')
    h1 = lax.conv_general_dilated(y, w1, (1, 1), ((1, 1), (1, 1)), dimension_numbers=dn)
    h1 = h1 + b1[None, :, None, None]
    h1 = jnp.where(h1 >= 0, h1, 0.2 * h1)
    h2 = lax.conv_general_dilated(h1, w2, (1, 1), 'VALID', dimension_numbers=dn)
    h2 = h2 + b2[None, :, None, None]
    h2 = jnp.where(h2 >= 0, h2, 0.2 * h2)
    h3 = lax.conv_general_dilated(h2, w3, (1, 1), 'VALID', dimension_numbers=dn)
    h3 = h3 + b3[None, :, None, None]
    return h3.reshape(-1)
    # NOTE: self.sigmoid is defined in __init__ but unused in forward -> intentionally omitted.


if __name__ == "__main__":
    key = jax.random.PRNGKey(0)
    kx, kp = jax.random.split(key)
    C, Cout, H, W = 4, 8, 4, 4                 # 4x4 spatial required by the 4x4 'valid' conv_2
    params = init_params(kp, C, Cout, use_eql=True)
    fwd = jax.jit(dis_final_block_forward, static_argnames=("matmul_dtype",))

    # N=2: single-block grid; N=20: multi-block grid + batch-padding path.
    for N in (2, 20):
        x = jax.random.normal(jax.random.fold_in(kx, N), (N, C, H, W), jnp.float32)
        ref = jax.block_until_ready(ref_forward(x, params))

        # f32 matmul path: tight check against the pure-JAX reference.
        out_f32 = jax.block_until_ready(fwd(x, params, matmul_dtype=jnp.float32))
        assert out_f32.shape == (N,)
        np.testing.assert_allclose(np.asarray(out_f32), np.asarray(ref), rtol=1e-3, atol=1e-3)

        # Default fast path: bf16 MXU operands with f32 accumulation (relaxed tolerance).
        out_bf16 = jax.block_until_ready(fwd(x, params))
        assert out_bf16.shape == (N,)
        np.testing.assert_allclose(np.asarray(out_bf16), np.asarray(ref), rtol=5e-2, atol=1e-1)

    print("KERNEL_OK")
</pallas_src>

<mosaic_0001>
module attributes {stable_mosaic.version = 11 : i64} {
  func.func @_dis_final_block_kernel(%arg0: i32, %arg1: memref<6x6x8x4xf32, #tpu.memory_space<vmem>>, %arg2: memref<16x128xf32, #tpu.memory_space<vmem>>, %arg3: memref<9x4x128xf32, #tpu.memory_space<vmem>>, %arg4: memref<2048x8xf32, #tpu.memory_space<vmem>>, %arg5: memref<1x8xf32, #tpu.memory_space<vmem>>, %arg6: memref<1x8xf32, #tpu.memory_space<vmem>>, %arg7: memref<1x1xf32, #tpu.memory_space<vmem>>, %arg8: memref<1x1x8xf32, #tpu.memory_space<vmem>>, %arg9: memref<128x128xf32, #tpu.memory_space<vmem>>, %arg10: memref<8x2048xf32, #tpu.memory_space<vmem>>) attributes {dimension_semantics = [#tpu.dimension_semantics<parallel>], iteration_bounds = array<i64: 1>, scalar_prefetch = 0 : i64, scratch_operands = 2 : i64, tpu.core_type = #tpu.core_type<tc>, window_params = [{transform_indices = @transform_0, window_bounds = array<i64: 6, 6, 8, 4>}, {pipeline_mode = #tpu.pipeline_mode<synchronous>, transform_indices = @transform_1, window_bounds = array<i64: 16, 128>}, {pipeline_mode = #tpu.pipeline_mode<synchronous>, transform_indices = @transform_2, window_bounds = array<i64: 9, 4, 128>}, {pipeline_mode = #tpu.pipeline_mode<synchronous>, transform_indices = @transform_3, window_bounds = array<i64: 2048, 8>}, {pipeline_mode = #tpu.pipeline_mode<synchronous>, transform_indices = @transform_4, window_bounds = array<i64: 1, 8>}, {pipeline_mode = #tpu.pipeline_mode<synchronous>, transform_indices = @transform_5, window_bounds = array<i64: 1, 8>}, {pipeline_mode = #tpu.pipeline_mode<synchronous>, transform_indices = @transform_6, window_bounds = array<i64: 1, 1>}, {transform_indices = @transform_7, window_bounds = array<i64: 1, 1, 8>}]} {
    %c0 = arith.constant 0 : index
    %c0_0 = arith.constant 0 : index
    %c0_1 = arith.constant 0 : index
    %c0_2 = arith.constant 0 : index
    %0 = vector.load %arg1[%c0, %c0_0, %c0_1, %c0_2] : memref<6x6x8x4xf32, #tpu.memory_space<vmem>>, vector<4x4x8x4xf32>
    %1 = vector.shape_cast %0 : vector<4x4x8x4xf32> to vector<128x4xf32>
    %c0_3 = arith.constant 0 : index
    %c0_4 = arith.constant 0 : index
    %c0_5 = arith.constant 0 : index
    %2 = vector.load %arg3[%c0_3, %c0_4, %c0_5] : memref<9x4x128xf32, #tpu.memory_space<vmem>>, vector<1x4x128xf32>
    %3 = vector.shape_cast %2 : vector<1x4x128xf32> to vector<4x128xf32>
    %cst = arith.constant dense<0.000000e+00> : vector<128x128xf32>
    %4 = tpu.matmul %1, %3, %cst {dimension_numbers = #tpu.dot_dimension_numbers<[1], [0], [0], [1], [0, 0, 1, 1], [], []>} : vector<128x4xf32>, vector<4x128xf32>, vector<128x128xf32> -> vector<128x128xf32>
    %c0_6 = arith.constant 0 : index
    %c0_7 = arith.constant 0 : index
    %5 = vector.load %arg9[%c0_6, %c0_7] : memref<128x128xf32, #tpu.memory_space<vmem>>, vector<128x128xf32>
    tpu.vector_store %arg9[%c0_6, %c0_7], %4 {strides = array<i32>} : memref<128x128xf32, #tpu.memory_space<vmem>>, vector<128x128xf32>,
    %c0_8 = arith.constant 0 : index
    %c1 = arith.constant 1 : index
    %c0_9 = arith.constant 0 : index
    %c0_10 = arith.constant 0 : index
    %6 = vector.load %arg1[%c0_8, %c1, %c0_9, %c0_10] : memref<6x6x8x4xf32, #tpu.memory_space<vmem>>, vector<4x4x8x4xf32>
    %7 = vector.shape_cast %6 : vector<4x4x8x4xf32> to vector<128x4xf32>
    %c1_11 = arith.constant 1 : index
    %c0_12 = arith.constant 0 : index
    %c0_13 = arith.constant 0 : index
    %8 = vector.load %arg3[%c1_11, %c0_12, %c0_13] : memref<9x4x128xf32, #tpu.memory_space<vmem>>, vector<1x4x128xf32>
    %9 = vector.shape_cast %8 : vector<1x4x128xf32> to vector<4x128xf32>
    %cst_14 = arith.constant dense<0.000000e+00> : vector<128x128xf32>
    %10 = tpu.matmul %7, %9, %cst_14 {dimension_numbers = #tpu.dot_dimension_numbers<[1], [0], [0], [1], [0, 0, 1, 1], [], []>} : vector<128x4xf32>, vector<4x128xf32>, vector<128x128xf32> -> vector<128x128xf32>
    %c0_15 = arith.constant 0 : index
    %c0_16 = arith.constant 0 : index
    %11 = vector.load %arg9[%c0_15, %c0_16] : memref<128x128xf32, #tpu.memory_space<vmem>>, vector<128x128xf32>
    %12 = arith.addf %11, %10 : vector<128x128xf32>
    %c0_17 = arith.constant 0 : index
    %c0_18 = arith.constant 0 : index
    %13 = vector.load %arg9[%c0_17, %c0_18] : memref<128x128xf32, #tpu.memory_space<vmem>>, vector<128x128xf32>
    tpu.vector_store %arg9[%c0_17, %c0_18], %12 {strides = array<i32>} : memref<128x128xf32, #tpu.memory_space<vmem>>, vector<128x128xf32>,
    %c0_19 = arith.constant 0 : index
    %c2 = arith.constant 2 : index
    %c0_20 = arith.constant 0 : index
    %c0_21 = arith.constant 0 : index
    %14 = vector.load %arg1[%c0_19, %c2, %c0_20, %c0_21] : memref<6x6x8x4xf32, #tpu.memory_space<vmem>>, vector<4x4x8x4xf32>
    %15 = vector.shape_cast %14 : vector<4x4x8x4xf32> to vector<128x4xf32>
    %c2_22 = arith.constant 2 : index
    %c0_23 = arith.constant 0 : index
    %c0_24 = arith.constant 0 : index
    %16 = vector.load %arg3[%c2_22, %c0_23, %c0_24] : memref<9x4x128xf32, #tpu.memory_space<vmem>>, vector<1x4x128xf32>
    %17 = vector.shape_cast %16 : vector<1x4x128xf32> to vector<4x128xf32>
    %cst_25 = arith.constant dense<0.000000e+00> : vector<128x128xf32>
    %18 = tpu.matmul %15, %17, %cst_25 {dimension_numbers = #tpu.dot_dimension_numbers<[1], [0], [0], [1], [0, 0, 1, 1], [], []>} : vector<128x4xf32>, vector<4x128xf32>, vector<128x128xf32> -> vector<128x128xf32>
    %c0_26 = arith.constant 0 : index
    %c0_27 = arith.constant 0 : index
    %19 = vector.load %arg9[%c0_26, %c0_27] : memref<128x128xf32, #tpu.memory_space<vmem>>, vector<128x128xf32>
    %20 = arith.addf %19, %18 : vector<128x128xf32>
    %c0_28 = arith.constant 0 : index
    %c0_29 = arith.constant 0 : index
    %21 = vector.load %arg9[%c0_28, %c0_29] : memref<128x128xf32, #tpu.memory_space<vmem>>, vector<128x128xf32>
    tpu.vector_store %arg9[%c0_28, %c0_29], %20 {strides = array<i32>} : memref<128x128xf32, #tpu.memory_space<vmem>>, vector<128x128xf32>,
    %c1_30 = arith.constant 1 : index
    %c0_31 = arith.constant 0 : index
    %c0_32 = arith.constant 0 : index
    %c0_33 = arith.constant 0 : index
    %22 = vector.load %arg1[%c1_30, %c0_31, %c0_32, %c0_33] : memref<6x6x8x4xf32, #tpu.memory_space<vmem>>, vector<4x4x8x4xf32>
    %23 = vector.shape_cast %22 : vector<4x4x8x4xf32> to vector<128x4xf32>
    %c3 = arith.constant 3 : index
    %c0_34 = arith.constant 0 : index
    %c0_35 = arith.constant 0 : index
    %24 = vector.load %arg3[%c3, %c0_34, %c0_35] : memref<9x4x128xf32, #tpu.memory_space<vmem>>, vector<1x4x128xf32>
    %25 = vector.shape_cast %24 : vector<1x4x128xf32> to vector<4x128xf32>
    %cst_36 = arith.constant dense<0.000000e+00> : vector<128x128xf32>
    %26 = tpu.matmul %23, %25, %cst_36 {dimension_numbers = #tpu.dot_dimension_numbers<[1], [0], [0], [1], [0, 0, 1, 1], [], []>} : vector<128x4xf32>, vector<4x128xf32>, vector<128x128xf32> -> vector<128x128xf32>
    %c0_37 = arith.constant 0 : index
    %c0_38 = arith.constant 0 : index
    %27 = vector.load %arg9[%c0_37, %c0_38] : memref<128x128xf32, #tpu.memory_space<vmem>>, vector<128x128xf32>
    %28 = arith.addf %27, %26 : vector<128x128xf32>
    %c0_39 = arith.constant 0 : index
    %c0_40 = arith.constant 0 : index
    %29 = vector.load %arg9[%c0_39, %c0_40] : memref<128x128xf32, #tpu.memory_space<vmem>>, vector<128x128xf32>
    tpu.vector_store %arg9[%c0_39, %c0_40], %28 {strides = array<i32>} : memref<128x128xf32, #tpu.memory_space<vmem>>, vector<128x128xf32>,
    %c1_41 = arith.constant 1 : index
    %c1_42 = arith.constant 1 : index
    %c0_43 = arith.constant 0 : index
    %c0_44 = arith.constant 0 : index
    %30 = vector.load %arg1[%c1_41, %c1_42, %c0_43, %c0_44] : memref<6x6x8x4xf32, #tpu.memory_space<vmem>>, vector<4x4x8x4xf32>
    %31 = vector.shape_cast %30 : vector<4x4x8x4xf32> to vector<128x4xf32>
    %c4 = arith.constant 4 : index
    %c0_45 = arith.constant 0 : index
    %c0_46 = arith.constant 0 : index
    %32 = vector.load %arg3[%c4, %c0_45, %c0_46] : memref<9x4x128xf32, #tpu.memory_space<vmem>>, vector<1x4x128xf32>
    %33 = vector.shape_cast %32 : vector<1x4x128xf32> to vector<4x128xf32>
    %cst_47 = arith.constant dense<0.000000e+00> : vector<128x128xf32>
    %34 = tpu.matmul %31, %33, %cst_47 {dimension_numbers = #tpu.dot_dimension_numbers<[1], [0], [0], [1], [0, 0, 1, 1], [], []>} : vector<128x4xf32>, vector<4x128xf32>, vector<128x128xf32> -> vector<128x128xf32>
    %c0_48 = arith.constant 0 : index
    %c0_49 = arith.constant 0 : index
    %35 = vector.load %arg9[%c0_48, %c0_49] : memref<128x128xf32, #tpu.memory_space<vmem>>, vector<128x128xf32>
    %36 = arith.addf %35, %34 : vector<128x128xf32>
    %c0_50 = arith.constant 0 : index
    %c0_51 = arith.constant 0 : index
    %37 = vector.load %arg9[%c0_50, %c0_51] : memref<128x128xf32, #tpu.memory_space<vmem>>, vector<128x128xf32>
    tpu.vector_store %arg9[%c0_50, %c0_51], %36 {strides = array<i32>} : memref<128x128xf32, #tpu.memory_space<vmem>>, vector<128x128xf32>,
    %c1_52 = arith.constant 1 : index
    %c2_53 = arith.constant 2 : index
    %c0_54 = arith.constant 0 : index
    %c0_55 = arith.constant 0 : index
    %38 = vector.load %arg1[%c1_52, %c2_53, %c0_54, %c0_55] : memref<6x6x8x4xf32, #tpu.memory_space<vmem>>, vector<4x4x8x4xf32>
    %39 = vector.shape_cast %38 : vector<4x4x8x4xf32> to vector<128x4xf32>
    %c5 = arith.constant 5 : index
    %c0_56 = arith.constant 0 : index
    %c0_57 = arith.constant 0 : index
    %40 = vector.load %arg3[%c5, %c0_56, %c0_57] : memref<9x4x128xf32, #tpu.memory_space<vmem>>, vector<1x4x128xf32>
    %41 = vector.shape_cast %40 : vector<1x4x128xf32> to vector<4x128xf32>
    %cst_58 = arith.constant dense<0.000000e+00> : vector<128x128xf32>
    %42 = tpu.matmul %39, %41, %cst_58 {dimension_numbers = #tpu.dot_dimension_numbers<[1], [0], [0], [1], [0, 0, 1, 1], [], []>} : vector<128x4xf32>, vector<4x128xf32>, vector<128x128xf32> -> vector<128x128xf32>
    %c0_59 = arith.constant 0 : index
    %c0_60 = arith.constant 0 : index
    %43 = vector.load %arg9[%c0_59, %c0_60] : memref<128x128xf32, #tpu.memory_space<vmem>>, vector<128x128xf32>
    %44 = arith.addf %43, %42 : vector<128x128xf32>
    %c0_61 = arith.constant 0 : index
    %c0_62 = arith.constant 0 : index
    %45 = vector.load %arg9[%c0_61, %c0_62] : memref<128x128xf32, #tpu.memory_space<vmem>>, vector<128x128xf32>
    tpu.vector_store %arg9[%c0_61, %c0_62], %44 {strides = array<i32>} : memref<128x128xf32, #tpu.memory_space<vmem>>, vector<128x128xf32>,
    %c2_63 = arith.constant 2 : index
    %c0_64 = arith.constant 0 : index
    %c0_65 = arith.constant 0 : index
    %c0_66 = arith.constant 0 : index
    %46 = vector.load %arg1[%c2_63, %c0_64, %c0_65, %c0_66] : memref<6x6x8x4xf32, #tpu.memory_space<vmem>>, vector<4x4x8x4xf32>
    %47 = vector.shape_cast %46 : vector<4x4x8x4xf32> to vector<128x4xf32>
    %c6 = arith.constant 6 : index
    %c0_67 = arith.constant 0 : index
    %c0_68 = arith.constant 0 : index
    %48 = vector.load %arg3[%c6, %c0_67, %c0_68] : memref<9x4x128xf32, #tpu.memory_space<vmem>>, vector<1x4x128xf32>
    %49 = vector.shape_cast %48 : vector<1x4x128xf32> to vector<4x128xf32>
    %cst_69 = arith.constant dense<0.000000e+00> : vector<128x128xf32>
    %50 = tpu.matmul %47, %49, %cst_69 {dimension_numbers = #tpu.dot_dimension_numbers<[1], [0], [0], [1], [0, 0, 1, 1], [], []>} : vector<128x4xf32>, vector<4x128xf32>, vector<128x128xf32> -> vector<128x128xf32>
    %c0_70 = arith.constant 0 : index
    %c0_71 = arith.constant 0 : index
    %51 = vector.load %arg9[%c0_70, %c0_71] : memref<128x128xf32, #tpu.memory_space<vmem>>, vector<128x128xf32>
    %52 = arith.addf %51, %50 : vector<128x128xf32>
    %c0_72 = arith.constant 0 : index
    %c0_73 = arith.constant 0 : index
    %53 = vector.load %arg9[%c0_72, %c0_73] : memref<128x128xf32, #tpu.memory_space<vmem>>, vector<128x128xf32>
    tpu.vector_store %arg9[%c0_72, %c0_73], %52 {strides = array<i32>} : memref<128x128xf32, #tpu.memory_space<vmem>>, vector<128x128xf32>,
    %c2_74 = arith.constant 2 : index
    %c1_75 = arith.constant 1 : index
    %c0_76 = arith.constant 0 : index
    %c0_77 = arith.constant 0 : index
    %54 = vector.load %arg1[%c2_74, %c1_75, %c0_76, %c0_77] : memref<6x6x8x4xf32, #tpu.memory_space<vmem>>, vector<4x4x8x4xf32>
    %55 = vector.shape_cast %54 : vector<4x4x8x4xf32> to vector<128x4xf32>
    %c7 = arith.constant 7 : index
    %c0_78 = arith.constant 0 : index
    %c0_79 = arith.constant 0 : index
    %56 = vector.load %arg3[%c7, %c0_78, %c0_79] : memref<9x4x128xf32, #tpu.memory_space<vmem>>, vector<1x4x128xf32>
    %57 = vector.shape_cast %56 : vector<1x4x128xf32> to vector<4x128xf32>
    %cst_80 = arith.constant dense<0.000000e+00> : vector<128x128xf32>
    %58 = tpu.matmul %55, %57, %cst_80 {dimension_numbers = #tpu.dot_dimension_numbers<[1], [0], [0], [1], [0, 0, 1, 1], [], []>} : vector<128x4xf32>, vector<4x128xf32>, vector<128x128xf32> -> vector<128x128xf32>
    %c0_81 = arith.constant 0 : index
    %c0_82 = arith.constant 0 : index
    %59 = vector.load %arg9[%c0_81, %c0_82] : memref<128x128xf32, #tpu.memory_space<vmem>>, vector<128x128xf32>
    %60 = arith.addf %59, %58 : vector<128x128xf32>
    %c0_83 = arith.constant 0 : index
    %c0_84 = arith.constant 0 : index
    %61 = vector.load %arg9[%c0_83, %c0_84] : memref<128x128xf32, #tpu.memory_space<vmem>>, vector<128x128xf32>
    tpu.vector_store %arg9[%c0_83, %c0_84], %60 {strides = array<i32>} : memref<128x128xf32, #tpu.memory_space<vmem>>, vector<128x128xf32>,
    %c2_85 = arith.constant 2 : index
    %c2_86 = arith.constant 2 : index
    %c0_87 = arith.constant 0 : index
    %c0_88 = arith.constant 0 : index
    %62 = vector.load %arg1[%c2_85, %c2_86, %c0_87, %c0_88] : memref<6x6x8x4xf32, #tpu.memory_space<vmem>>, vector<4x4x8x4xf32>
    %63 = vector.shape_cast %62 : vector<4x4x8x4xf32> to vector<128x4xf32>
    %c8 = arith.constant 8 : index
    %c0_89 = arith.constant 0 : index
    %c0_90 = arith.constant 0 : index
    %64 = vector.load %arg3[%c8, %c0_89, %c0_90] : memref<9x4x128xf32, #tpu.memory_space<vmem>>, vector<1x4x128xf32>
    %65 = vector.shape_cast %64 : vector<1x4x128xf32> to vector<4x128xf32>
    %cst_91 = arith.constant dense<0.000000e+00> : vector<128x128xf32>
    %66 = tpu.matmul %63, %65, %cst_91 {dimension_numbers = #tpu.dot_dimension_numbers<[1], [0], [0], [1], [0, 0, 1, 1], [], []>} : vector<128x4xf32>, vector<4x128xf32>, vector<128x128xf32> -> vector<128x128xf32>
    %c0_92 = arith.constant 0 : index
    %c0_93 = arith.constant 0 : index
    %67 = vector.load %arg9[%c0_92, %c0_93] : memref<128x128xf32, #tpu.memory_space<vmem>>, vector<128x128xf32>
    %68 = arith.addf %67, %66 : vector<128x128xf32>
    %c0_94 = arith.constant 0 : index
    %c0_95 = arith.constant 0 : index
    %69 = vector.load %arg9[%c0_94, %c0_95] : memref<128x128xf32, #tpu.memory_space<vmem>>, vector<128x128xf32>
    tpu.vector_store %arg9[%c0_94, %c0_95], %68 {strides = array<i32>} : memref<128x128xf32, #tpu.memory_space<vmem>>, vector<128x128xf32>,
    %c0_96 = arith.constant 0 : index
    %c0_97 = arith.constant 0 : index
    %70 = vector.load %arg9[%c0_96, %c0_97] : memref<128x128xf32, #tpu.memory_space<vmem>>, vector<8x128xf32>
    %c0_98 = arith.constant 0 : index
    %c0_99 = arith.constant 0 : index
    %71 = vector.load %arg2[%c0_98, %c0_99] : memref<16x128xf32, #tpu.memory_space<vmem>>, vector<1x128xf32>
    %72 = vector.broadcast %71 : vector<1x128xf32> to vector<8x128xf32>
    %73 = arith.addf %70, %72 : vector<8x128xf32>
    %cst_100 = arith.constant 0.000000e+00 : f32
    %74 = vector.broadcast %cst_100 : f32 to vector<8x128xf32>
    %75 = arith.cmpf oge, %73, %74 : vector<8x128xf32>
    %cst_101 = arith.constant 2.000000e-01 : f32
    %76 = vector.broadcast %cst_101 : f32 to vector<8x128xf32>
    %77 = arith.mulf %76, %73 : vector<8x128xf32>
    %78 = arith.select %75, %73, %77 : vector<8x128xi1>, vector<8x128xf32>
    %c0_102 = arith.constant 0 : index
    %c0_103 = arith.constant 0 : index
    %79 = vector.load %arg10[%c0_102, %c0_103] : memref<8x2048xf32, #tpu.memory_space<vmem>>, vector<8x128xf32>
    tpu.vector_store %arg10[%c0_102, %c0_103], %78 {strides = array<i32>} : memref<8x2048xf32, #tpu.memory_space<vmem>>, vector<8x128xf32>,
    %c8_104 = arith.constant 8 : index
    %c0_105 = arith.constant 0 : index
    %80 = vector.load %arg9[%c8_104, %c0_105] : memref<128x128xf32, #tpu.memory_space<vmem>>, vector<8x128xf32>
    %c1_106 = arith.constant 1 : index
    %c0_107 = arith.constant 0 : index
    %81 = vector.load %arg2[%c1_106, %c0_107] : memref<16x128xf32, #tpu.memory_space<vmem>>, vector<1x128xf32>
    %82 = vector.broadcast %81 : vector<1x128xf32> to vector<8x128xf32>
    %83 = arith.addf %80, %82 : vector<8x128xf32>
    %cst_108 = arith.constant 0.000000e+00 : f32
    %84 = vector.broadcast %cst_108 : f32 to vector<8x128xf32>
    %85 = arith.cmpf oge, %83, %84 : vector<8x128xf32>
    %cst_109 = arith.constant 2.000000e-01 : f32
    %86 = vector.broadcast %cst_109 : f32 to vector<8x128xf32>
    %87 = arith.mulf %86, %83 : vector<8x128xf32>
    %88 = arith.select %85, %83, %87 : vector<8x128xi1>, vector<8x128xf32>
    %c0_110 = arith.constant 0 : index
    %c128 = arith.constant 128 : index
    %89 = vector.load %arg10[%c0_110, %c128] : memref<8x2048xf32, #tpu.memory_space<vmem>>, vector<8x128xf32>
    tpu.vector_store %arg10[%c0_110, %c128], %88 {strides = array<i32>} : memref<8x2048xf32, #tpu.memory_space<vmem>>, vector<8x128xf32>,
    %c16 = arith.constant 16 : index
    %c0_111 = arith.constant 0 : index
    %90 = vector.load %arg9[%c16, %c0_111] : memref<128x128xf32, #tpu.memory_space<vmem>>, vector<8x128xf32>
    %c2_112 = arith.constant 2 : index
    %c0_113 = arith.constant 0 : index
    %91 = vector.load %arg2[%c2_112, %c0_113] : memref<16x128xf32, #tpu.memory_space<vmem>>, vector<1x128xf32>
    %92 = vector.broadcast %91 : vector<1x128xf32> to vector<8x128xf32>
    %93 = arith.addf %90, %92 : vector<8x128xf32>
    %cst_114 = arith.constant 0.000000e+00 : f32
    %94 = vector.broadcast %cst_114 : f32 to vector<8x128xf32>
    %95 = arith.cmpf oge, %93, %94 : vector<8x128xf32>
    %cst_115 = arith.constant 2.000000e-01 : f32
    %96 = vector.broadcast %cst_115 : f32 to vector<8x128xf32>
    %97 = arith.mulf %96, %93 : vector<8x128xf32>
    %98 = arith.select %95, %93, %97 : vector<8x128xi1>, vector<8x128xf32>
    %c0_116 = arith.constant 0 : index
    %c256 = arith.constant 256 : index
    %99 = vector.load %arg10[%c0_116, %c256] : memref<8x2048xf32, #tpu.memory_space<vmem>>, vector<8x128xf32>
    tpu.vector_store %arg10[%c0_116, %c256], %98 {strides = array<i32>} : memref<8x2048xf32, #tpu.memory_space<vmem>>, vector<8x128xf32>,
    %c24 = arith.constant 24 : index
    %c0_117 = arith.constant 0 : index
    %100 = vector.load %arg9[%c24, %c0_117] : memref<128x128xf32, #tpu.memory_space<vmem>>, vector<8x128xf32>
    %c3_118 = arith.constant 3 : index
    %c0_119 = arith.constant 0 : index
    %101 = vector.load %arg2[%c3_118, %c0_119] : memref<16x128xf32, #tpu.memory_space<vmem>>, vector<1x128xf32>
    %102 = vector.broadcast %101 : vector<1x128xf32> to vector<8x128xf32>
    %103 = arith.addf %100, %102 : vector<8x128xf32>
    %cst_120 = arith.constant 0.000000e+00 : f32
    %104 = vector.broadcast %cst_120 : f32 to vector<8x128xf32>
    %105 = arith.cmpf oge, %103, %104 : vector<8x128xf32>
    %cst_121 = arith.constant 2.000000e-01 : f32
    %106 = vector.broadcast %cst_121 : f32 to vector<8x128xf32>
    %107 = arith.mulf %106, %103 : vector<8x128xf32>
    %108 = arith.select %105, %103, %107 : vector<8x128xi1>, vector<8x128xf32>
    %c0_122 = arith.constant 0 : index
    %c384 = arith.constant 384 : index
    %109 = vector.load %arg10[%c0_122, %c384] : memref<8x2048xf32, #tpu.memory_space<vmem>>, vector<8x128xf32>
    tpu.vector_store %arg10[%c0_122, %c384], %108 {strides = array<i32>} : memref<8x2048xf32, #tpu.memory_space<vmem>>, vector<8x128xf32>,
    %c32 = arith.constant 32 : index
    %c0_123 = arith.constant 0 : index
    %110 = vector.load %arg9[%c32, %c0_123] : memref<128x128xf32, #tpu.memory_space<vmem>>, vector<8x128xf32>
    %c4_124 = arith.constant 4 : index
    %c0_125 = arith.constant 0 : index
    %111 = vector.load %arg2[%c4_124, %c0_125] : memref<16x128xf32, #tpu.memory_space<vmem>>, vector<1x128xf32>
    %112 = vector.broadcast %111 : vector<1x128xf32> to vector<8x128xf32>
    %113 = arith.addf %110, %112 : vector<8x128xf32>
    %cst_126 = arith.constant 0.000000e+00 : f32
    %114 = vector.broadcast %cst_126 : f32 to vector<8x128xf32>
    %115 = arith.cmpf oge, %113, %114 : vector<8x128xf32>
    %cst_127 = arith.constant 2.000000e-01 : f32
    %116 = vector.broadcast %cst_127 : f32 to vector<8x128xf32>
    %117 = arith.mulf %116, %113 : vector<8x128xf32>
    %118 = arith.select %115, %113, %117 : vector<8x128xi1>, vector<8x128xf32>
    %c0_128 = arith.constant 0 : index
    %c512 = arith.constant 512 : index
    %119 = vector.load %arg10[%c0_128, %c512] : memref<8x2048xf32, #tpu.memory_space<vmem>>, vector<8x128xf32>
    tpu.vector_store %arg10[%c0_128, %c512], %118 {strides = array<i32>} : memref<8x2048xf32, #tpu.memory_space<vmem>>, vector<8x128xf32>,
    %c40 = arith.constant 40 : index
    %c0_129 = arith.constant 0 : index
    %120 = vector.load %arg9[%c40, %c0_129] : memref<128x128xf32, #tpu.memory_space<vmem>>, vector<8x128xf32>
    %c5_130 = arith.constant 5 : index
    %c0_131 = arith.constant 0 : index
    %121 = vector.load %arg2[%c5_130, %c0_131] : memref<16x128xf32, #tpu.memory_space<vmem>>, vector<1x128xf32>
    %122 = vector.broadcast %121 : vector<1x128xf32> to vector<8x128xf32>
    %123 = arith.addf %120, %122 : vector<8x128xf32>
    %cst_132 = arith.constant 0.000000e+00 : f32
    %124 = vector.broadcast %cst_132 : f32 to vector<8x128xf32>
    %125 = arith.cmpf oge, %123, %124 : vector<8x128xf32>
    %cst_133 = arith.constant 2.000000e-01 : f32
    %126 = vector.broadcast %cst_133 : f32 to vector<8x128xf32>
    %127 = arith.mulf %126, %123 : vector<8x128xf32>
    %128 = arith.select %125, %123, %127 : vector<8x128xi1>, vector<8x128xf32>
    %c0_134 = arith.constant 0 : index
    %c640 = arith.constant 640 : index
    %129 = vector.load %arg10[%c0_134, %c640] : memref<8x2048xf32, #tpu.memory_space<vmem>>, vector<8x128xf32>
    tpu.vector_store %arg10[%c0_134, %c640], %128 {strides = array<i32>} : memref<8x2048xf32, #tpu.memory_space<vmem>>, vector<8x128xf32>,
    %c48 = arith.constant 48 : index
    %c0_135 = arith.constant 0 : index
    %130 = vector.load %arg9[%c48, %c0_135] : memref<128x128xf32, #tpu.memory_space<vmem>>, vector<8x128xf32>
    %c6_136 = arith.constant 6 : index
    %c0_137 = arith.constant 0 : index
    %131 = vector.load %arg2[%c6_136, %c0_137] : memref<16x128xf32, #tpu.memory_space<vmem>>, vector<1x128xf32>
    %132 = vector.broadcast %131 : vector<1x128xf32> to vector<8x128xf32>
    %133 = arith.addf %130, %132 : vector<8x128xf32>
    %cst_138 = arith.constant 0.000000e+00 : f32
    %134 = vector.broadcast %cst_138 : f32 to vector<8x128xf32>
    %135 = arith.cmpf oge, %133, %134 : vector<8x128xf32>
    %cst_139 = arith.constant 2.000000e-01 : f32
    %136 = vector.broadcast %cst_139 : f32 to vector<8x128xf32>
    %137 = arith.mulf %136, %133 : vector<8x128xf32>
    %138 = arith.select %135, %133, %137 : vector<8x128xi1>, vector<8x128xf32>
    %c0_140 = arith.constant 0 : index
    %c768 = arith.constant 768 : index
    %139 = vector.load %arg10[%c0_140, %c768] : memref<8x2048xf32, #tpu.memory_space<vmem>>, vector<8x128xf32>
    tpu.vector_store %arg10[%c0_140, %c768], %138 {strides = array<i32>} : memref<8x2048xf32, #tpu.memory_space<vmem>>, vector<8x128xf32>,
    %c56 = arith.constant 56 : index
    %c0_141 = arith.constant 0 : index
    %140 = vector.load %arg9[%c56, %c0_141] : memref<128x128xf32, #tpu.memory_space<vmem>>, vector<8x128xf32>
    %c7_142 = arith.constant 7 : index
    %c0_143 = arith.constant 0 : index
    %141 = vector.load %arg2[%c7_142, %c0_143] : memref<16x128xf32, #tpu.memory_space<vmem>>, vector<1x128xf32>
    %142 = vector.broadcast %141 : vector<1x128xf32> to vector<8x128xf32>
    %143 = arith.addf %140, %142 : vector<8x128xf32>
    %cst_144 = arith.constant 0.000000e+00 : f32
    %144 = vector.broadcast %cst_144 : f32 to vector<8x128xf32>
    %145 = arith.cmpf oge, %143, %144 : vector<8x128xf32>
    %cst_145 = arith.constant 2.000000e-01 : f32
    %146 = vector.broadcast %cst_145 : f32 to vector<8x128xf32>
    %147 = arith.mulf %146, %143 : vector<8x128xf32>
    %148 = arith.select %145, %143, %147 : vector<8x128xi1>, vector<8x128xf32>
    %c0_146 = arith.constant 0 : index
    %c896 = arith.constant 896 : index
    %149 = vector.load %arg10[%c0_146, %c896] : memref<8x2048xf32, #tpu.memory_space<vmem>>, vector<8x128xf32>
    tpu.vector_store %arg10[%c0_146, %c896], %148 {strides = array<i32>} : memref<8x2048xf32, #tpu.memory_space<vmem>>, vector<8x128xf32>,
    %c64 = arith.constant 64 : index
    %c0_147 = arith.constant 0 : index
    %150 = vector.load %arg9[%c64, %c0_147] : memref<128x128xf32, #tpu.memory_space<vmem>>, vector<8x128xf32>
    %c8_148 = arith.constant 8 : index
    %c0_149 = arith.constant 0 : index
    %151 = vector.load %arg2[%c8_148, %c0_149] : memref<16x128xf32, #tpu.memory_space<vmem>>, vector<1x128xf32>
    %152 = vector.broadcast %151 : vector<1x128xf32> to vector<8x128xf32>
    %153 = arith.addf %150, %152 : vector<8x128xf32>
    %cst_150 = arith.constant 0.000000e+00 : f32
    %154 = vector.broadcast %cst_150 : f32 to vector<8x128xf32>
    %155 = arith.cmpf oge, %153, %154 : vector<8x128xf32>
    %cst_151 = arith.constant 2.000000e-01 : f32
    %156 = vector.broadcast %cst_151 : f32 to vector<8x128xf32>
    %157 = arith.mulf %156, %153 : vector<8x128xf32>
    %158 = arith.select %155, %153, %157 : vector<8x128xi1>, vector<8x128xf32>
    %c0_152 = arith.constant 0 : index
    %c1024 = arith.constant 1024 : index
    %159 = vector.load %arg10[%c0_152, %c1024] : memref<8x2048xf32, #tpu.memory_space<vmem>>, vector<8x128xf32>
    tpu.vector_store %arg10[%c0_152, %c1024], %158 {strides = array<i32>} : memref<8x2048xf32, #tpu.memory_space<vmem>>, vector<8x128xf32>,
    %c72 = arith.constant 72 : index
    %c0_153 = arith.constant 0 : index
    %160 = vector.load %arg9[%c72, %c0_153] : memref<128x128xf32, #tpu.memory_space<vmem>>, vector<8x128xf32>
    %c9 = arith.constant 9 : index
    %c0_154 = arith.constant 0 : index
    %161 = vector.load %arg2[%c9, %c0_154] : memref<16x128xf32, #tpu.memory_space<vmem>>, vector<1x128xf32>
    %162 = vector.broadcast %161 : vector<1x128xf32> to vector<8x128xf32>
    %163 = arith.addf %160, %162 : vector<8x128xf32>
    %cst_155 = arith.constant 0.000000e+00 : f32
    %164 = vector.broadcast %cst_155 : f32 to vector<8x128xf32>
    %165 = arith.cmpf oge, %163, %164 : vector<8x128xf32>
    %cst_156 = arith.constant 2.000000e-01 : f32
    %166 = vector.broadcast %cst_156 : f32 to vector<8x128xf32>
    %167 = arith.mulf %166, %163 : vector<8x128xf32>
    %168 = arith.select %165, %163, %167 : vector<8x128xi1>, vector<8x128xf32>
    %c0_157 = arith.constant 0 : index
    %c1152 = arith.constant 1152 : index
    %169 = vector.load %arg10[%c0_157, %c1152] : memref<8x2048xf32, #tpu.memory_space<vmem>>, vector<8x128xf32>
    tpu.vector_store %arg10[%c0_157, %c1152], %168 {strides = array<i32>} : memref<8x2048xf32, #tpu.memory_space<vmem>>, vector<8x128xf32>,
    %c80 = arith.constant 80 : index
    %c0_158 = arith.constant 0 : index
    %170 = vector.load %arg9[%c80, %c0_158] : memref<128x128xf32, #tpu.memory_space<vmem>>, vector<8x128xf32>
    %c10 = arith.constant 10 : index
    %c0_159 = arith.constant 0 : index
    %171 = vector.load %arg2[%c10, %c0_159] : memref<16x128xf32, #tpu.memory_space<vmem>>, vector<1x128xf32>
    %172 = vector.broadcast %171 : vector<1x128xf32> to vector<8x128xf32>
    %173 = arith.addf %170, %172 : vector<8x128xf32>
    %cst_160 = arith.constant 0.000000e+00 : f32
    %174 = vector.broadcast %cst_160 : f32 to vector<8x128xf32>
    %175 = arith.cmpf oge, %173, %174 : vector<8x128xf32>
    %cst_161 = arith.constant 2.000000e-01 : f32
    %176 = vector.broadcast %cst_161 : f32 to vector<8x128xf32>
    %177 = arith.mulf %176, %173 : vector<8x128xf32>
    %178 = arith.select %175, %173, %177 : vector<8x128xi1>, vector<8x128xf32>
    %c0_162 = arith.constant 0 : index
    %c1280 = arith.constant 1280 : index
    %179 = vector.load %arg10[%c0_162, %c1280] : memref<8x2048xf32, #tpu.memory_space<vmem>>, vector<8x128xf32>
    tpu.vector_store %arg10[%c0_162, %c1280], %178 {strides = array<i32>} : memref<8x2048xf32, #tpu.memory_space<vmem>>, vector<8x128xf32>,
    %c88 = arith.constant 88 : index
    %c0_163 = arith.constant 0 : index
    %180 = vector.load %arg9[%c88, %c0_163] : memref<128x128xf32, #tpu.memory_space<vmem>>, vector<8x128xf32>
    %c11 = arith.constant 11 : index
    %c0_164 = arith.constant 0 : index
    %181 = vector.load %arg2[%c11, %c0_164] : memref<16x128xf32, #tpu.memory_space<vmem>>, vector<1x128xf32>
    %182 = vector.broadcast %181 : vector<1x128xf32> to vector<8x128xf32>
    %183 = arith.addf %180, %182 : vector<8x128xf32>
    %cst_165 = arith.constant 0.000000e+00 : f32
    %184 = vector.broadcast %cst_165 : f32 to vector<8x128xf32>
    %185 = arith.cmpf oge, %183, %184 : vector<8x128xf32>
    %cst_166 = arith.constant 2.000000e-01 : f32
    %186 = vector.broadcast %cst_166 : f32 to vector<8x128xf32>
    %187 = arith.mulf %186, %183 : vector<8x128xf32>
    %188 = arith.select %185, %183, %187 : vector<8x128xi1>, vector<8x128xf32>
    %c0_167 = arith.constant 0 : index
    %c1408 = arith.constant 1408 : index
    %189 = vector.load %arg10[%c0_167, %c1408] : memref<8x2048xf32, #tpu.memory_space<vmem>>, vector<8x128xf32>
    tpu.vector_store %arg10[%c0_167, %c1408], %188 {strides = array<i32>} : memref<8x2048xf32, #tpu.memory_space<vmem>>, vector<8x128xf32>,
    %c96 = arith.constant 96 : index
    %c0_168 = arith.constant 0 : index
    %190 = vector.load %arg9[%c96, %c0_168] : memref<128x128xf32, #tpu.memory_space<vmem>>, vector<8x128xf32>
    %c12 = arith.constant 12 : index
    %c0_169 = arith.constant 0 : index
    %191 = vector.load %arg2[%c12, %c0_169] : memref<16x128xf32, #tpu.memory_space<vmem>>, vector<1x128xf32>
    %192 = vector.broadcast %191 : vector<1x128xf32> to vector<8x128xf32>
    %193 = arith.addf %190, %192 : vector<8x128xf32>
    %cst_170 = arith.constant 0.000000e+00 : f32
    %194 = vector.broadcast %cst_170 : f32 to vector<8x128xf32>
    %195 = arith.cmpf oge, %193, %194 : vector<8x128xf32>
    %cst_171 = arith.constant 2.000000e-01 : f32
    %196 = vector.broadcast %cst_171 : f32 to vector<8x128xf32>
    %197 = arith.mulf %196, %193 : vector<8x128xf32>
    %198 = arith.select %195, %193, %197 : vector<8x128xi1>, vector<8x128xf32>
    %c0_172 = arith.constant 0 : index
    %c1536 = arith.constant 1536 : index
    %199 = vector.load %arg10[%c0_172, %c1536] : memref<8x2048xf32, #tpu.memory_space<vmem>>, vector<8x128xf32>
    tpu.vector_store %arg10[%c0_172, %c1536], %198 {strides = array<i32>} : memref<8x2048xf32, #tpu.memory_space<vmem>>, vector<8x128xf32>,
    %c104 = arith.constant 104 : index
    %c0_173 = arith.constant 0 : index
    %200 = vector.load %arg9[%c104, %c0_173] : memref<128x128xf32, #tpu.memory_space<vmem>>, vector<8x128xf32>
    %c13 = arith.constant 13 : index
    %c0_174 = arith.constant 0 : index
    %201 = vector.load %arg2[%c13, %c0_174] : memref<16x128xf32, #tpu.memory_space<vmem>>, vector<1x128xf32>
    %202 = vector.broadcast %201 : vector<1x128xf32> to vector<8x128xf32>
    %203 = arith.addf %200, %202 : vector<8x128xf32>
    %cst_175 = arith.constant 0.000000e+00 : f32
    %204 = vector.broadcast %cst_175 : f32 to vector<8x128xf32>
    %205 = arith.cmpf oge, %203, %204 : vector<8x128xf32>
    %cst_176 = arith.constant 2.000000e-01 : f32
    %206 = vector.broadcast %cst_176 : f32 to vector<8x128xf32>
    %207 = arith.mulf %206, %203 : vector<8x128xf32>
    %208 = arith.select %205, %203, %207 : vector<8x128xi1>, vector<8x128xf32>
    %c0_177 = arith.constant 0 : index
    %c1664 = arith.constant 1664 : index
    %209 = vector.load %arg10[%c0_177, %c1664] : memref<8x2048xf32, #tpu.memory_space<vmem>>, vector<8x128xf32>
    tpu.vector_store %arg10[%c0_177, %c1664], %208 {strides = array<i32>} : memref<8x2048xf32, #tpu.memory_space<vmem>>, vector<8x128xf32>,
    %c112 = arith.constant 112 : index
    %c0_178 = arith.constant 0 : index
    %210 = vector.load %arg9[%c112, %c0_178] : memref<128x128xf32, #tpu.memory_space<vmem>>, vector<8x128xf32>
    %c14 = arith.constant 14 : index
    %c0_179 = arith.constant 0 : index
    %211 = vector.load %arg2[%c14, %c0_179] : memref<16x128xf32, #tpu.memory_space<vmem>>, vector<1x128xf32>
    %212 = vector.broadcast %211 : vector<1x128xf32> to vector<8x128xf32>
    %213 = arith.addf %210, %212 : vector<8x128xf32>
    %cst_180 = arith.constant 0.000000e+00 : f32
    %214 = vector.broadcast %cst_180 : f32 to vector<8x128xf32>
    %215 = arith.cmpf oge, %213, %214 : vector<8x128xf32>
    %cst_181 = arith.constant 2.000000e-01 : f32
    %216 = vector.broadcast %cst_181 : f32 to vector<8x128xf32>
    %217 = arith.mulf %216, %213 : vector<8x128xf32>
    %218 = arith.select %215, %213, %217 : vector<8x128xi1>, vector<8x128xf32>
    %c0_182 = arith.constant 0 : index
    %c1792 = arith.constant 1792 : index
    %219 = vector.load %arg10[%c0_182, %c1792] : memref<8x2048xf32, #tpu.memory_space<vmem>>, vector<8x128xf32>
    tpu.vector_store %arg10[%c0_182, %c1792], %218 {strides = array<i32>} : memref<8x2048xf32, #tpu.memory_space<vmem>>, vector<8x128xf32>,
    %c120 = arith.constant 120 : index
    %c0_183 = arith.constant 0 : index
    %220 = vector.load %arg9[%c120, %c0_183] : memref<128x128xf32, #tpu.memory_space<vmem>>, vector<8x128xf32>
    %c15 = arith.constant 15 : index
    %c0_184 = arith.constant 0 : index
    %221 = vector.load %arg2[%c15, %c0_184] : memref<16x128xf32, #tpu.memory_space<vmem>>, vector<1x128xf32>
    %222 = vector.broadcast %221 : vector<1x128xf32> to vector<8x128xf32>
    %223 = arith.addf %220, %222 : vector<8x128xf32>
    %cst_185 = arith.constant 0.000000e+00 : f32
    %224 = vector.broadcast %cst_185 : f32 to vector<8x128xf32>
    %225 = arith.cmpf oge, %223, %224 : vector<8x128xf32>
    %cst_186 = arith.constant 2.000000e-01 : f32
    %226 = vector.broadcast %cst_186 : f32 to vector<8x128xf32>
    %227 = arith.mulf %226, %223 : vector<8x128xf32>
    %228 = arith.select %225, %223, %227 : vector<8x128xi1>, vector<8x128xf32>
    %c0_187 = arith.constant 0 : index
    %c1920 = arith.constant 1920 : index
    %229 = vector.load %arg10[%c0_187, %c1920] : memref<8x2048xf32, #tpu.memory_space<vmem>>, vector<8x128xf32>
    tpu.vector_store %arg10[%c0_187, %c1920], %228 {strides = array<i32>} : memref<8x2048xf32, #tpu.memory_space<vmem>>, vector<8x128xf32>,
    %c0_188 = arith.constant 0 : index
    %c0_189 = arith.constant 0 : index
    %230 = vector.load %arg10[%c0_188, %c0_189] : memref<8x2048xf32, #tpu.memory_space<vmem>>, vector<8x2048xf32>
    %c0_190 = arith.constant 0 : index
    %c0_191 = arith.constant 0 : index
    %231 = vector.load %arg4[%c0_190, %c0_191] : memref<2048x8xf32, #tpu.memory_space<vmem>>, vector<2048x8xf32>
    %cst_192 = arith.constant dense<0.000000e+00> : vector<8x8xf32>
    %232 = tpu.matmul %230, %231, %cst_192 {dimension_numbers = #tpu.dot_dimension_numbers<[1], [0], [0], [1], [0, 0, 1, 1], [], []>} : vector<8x2048xf32>, vector<2048x8xf32>, vector<8x8xf32> -> vector<8x8xf32>
    %c0_193 = arith.constant 0 : index
    %c0_194 = arith.constant 0 : index
    %233 = vector.load %arg5[%c0_193, %c0_194] : memref<1x8xf32, #tpu.memory_space<vmem>>, vector<1x8xf32>
    %234 = vector.broadcast %233 : vector<1x8xf32> to vector<8x8xf32>
    %235 = arith.addf %232, %234 : vector<8x8xf32>
    %cst_195 = arith.constant 0.000000e+00 : f32
    %236 = vector.broadcast %cst_195 : f32 to vector<8x8xf32>
    %237 = arith.cmpf oge, %235, %236 : vector<8x8xf32>
    %cst_196 = arith.constant 2.000000e-01 : f32
    %238 = vector.broadcast %cst_196 : f32 to vector<8x8xf32>
    %239 = arith.mulf %238, %235 : vector<8x8xf32>
    %240 = arith.select %237, %235, %239 : vector<8x8xi1>, vector<8x8xf32>
    %c0_197 = arith.constant 0 : index
    %c0_198 = arith.constant 0 : index
    %241 = vector.load %arg6[%c0_197, %c0_198] : memref<1x8xf32, #tpu.memory_space<vmem>>, vector<1x8xf32>
    %cst_199 = arith.constant dense<0.000000e+00> : vector<1x8xf32>
    %242 = tpu.matmul %241, %240, %cst_199 {dimension_numbers = #tpu.dot_dimension_numbers<[1], [1], [0], [0], [0, 0, 1, 0], [], []>} : vector<1x8xf32>, vector<8x8xf32>, vector<1x8xf32> -> vector<1x8xf32>
    %c0_200 = arith.constant 0 : index
    %c0_201 = arith.constant 0 : index
    %243 = vector.load %arg7[%c0_200, %c0_201] : memref<1x1xf32, #tpu.memory_space<vmem>>, vector<1x1xf32>
    %244 = vector.broadcast %243 : vector<1x1xf32> to vector<1x8xf32>
    %245 = arith.addf %242, %244 : vector<1x8xf32>
    %246 = vector.shape_cast %245 : vector<1x8xf32> to vector<1x1x8xf32>
    %c0_202 = arith.constant 0 : index
    %c0_203 = arith.constant 0 : index
    %c0_204 = arith.constant 0 : index
    %247 = vector.load %arg8[%c0_202, %c0_203, %c0_204] : memref<1x1x8xf32, #tpu.memory_space<vmem>>, vector<1x1x8xf32>
    tpu.vector_store %arg8[%c0_202, %c0_203, %c0_204], %246 {strides = array<i32>} : memref<1x1x8xf32, #tpu.memory_space<vmem>>, vector<1x1x8xf32>,
    return
  }
  func.func @transform_0(%arg0: i32) -> (i32, i32, i32, i32) {
    %c0_i32 = arith.constant 0 : i32
    %c0_i32_0 = arith.constant 0 : i32
    %c0_i32_1 = arith.constant 0 : i32
    %c0_i32_2 = arith.constant 0 : i32
    return %c0_i32, %c0_i32_0, %arg0, %c0_i32_1 : i32, i32, i32, i32
  }
  func.func @transform_1(%arg0: i32) -> (i32, i32) {
    %c0_i32 = arith.constant 0 : i32
    %c0_i32_0 = arith.constant 0 : i32
    %c0_i32_1 = arith.constant 0 : i32
    return %c0_i32, %c0_i32_0 : i32, i32
  }
  func.func @transform_2(%arg0: i32) -> (i32, i32, i32) {
    %c0_i32 = arith.constant 0 : i32
    %c0_i32_0 = arith.constant 0 : i32
    %c0_i32_1 = arith.constant 0 : i32
    %c0_i32_2 = arith.constant 0 : i32
    return %c0_i32, %c0_i32_0, %c0_i32_1 : i32, i32, i32
  }
  func.func @transform_3(%arg0: i32) -> (i32, i32) {
    %c0_i32 = arith.constant 0 : i32
    %c0_i32_0 = arith.constant 0 : i32
    %c0_i32_1 = arith.constant 0 : i32
    return %c0_i32, %c0_i32_0 : i32, i32
  }
  func.func @transform_4(%arg0: i32) -> (i32, i32) {
    %c0_i32 = arith.constant 0 : i32
    %c0_i32_0 = arith.constant 0 : i32
    %c0_i32_1 = arith.constant 0 : i32
    return %c0_i32, %c0_i32_0 : i32, i32
  }
  func.func @transform_5(%arg0: i32) -> (i32, i32) {
    %c0_i32 = arith.constant 0 : i32
    %c0_i32_0 = arith.constant 0 : i32
    %c0_i32_1 = arith.constant 0 : i32
    return %c0_i32, %c0_i32_0 : i32, i32
  }
  func.func @transform_6(%arg0: i32) -> (i32, i32) {
    %c0_i32 = arith.constant 0 : i32
    %c0_i32_0 = arith.constant 0 : i32
    %c0_i32_1 = arith.constant 0 : i32
    return %c0_i32, %c0_i32_0 : i32, i32
  }
  func.func @transform_7(%arg0: i32) -> (i32, i32, i32) {
    %c0_i32 = arith.constant 0 : i32
    %c0_i32_0 = arith.constant 0 : i32
    %c0_i32_1 = arith.constant 0 : i32
    return %arg0, %c0_i32, %c0_i32_0 : i32, i32, i32
  }
}

</mosaic_0001>

<bundles_post_ra>
// kernel: dis_final_block_forward.1
= control target key start
LH: loop header
LB: loop body
LE: loop exit
PB: predicated region body
PF: predicated region fallthrough
CT: control target
= control target key end

     0   :  { %vm94_vm0 = vcmask 1043456   ;;  %vm45_vm1 = vcmask 31744   ;;  %s4296_s2 = inlined_call_operand.vmem [shape: f32[9,4,128], index: 2, kind: input, shape index: {}]   ;;  %s4297_s0 = inlined_call_operand.vmem [shape: f32[6,6,8,4], index: 0, kind: input, shape index: {}]   ;;  %s4298_s1 = inlined_call_operand.vmem [shape: f32[16,128], index: 1, kind: input, shape index: {}]   ;;  %s4299_s3 = inlined_call_operand.vmem [shape: f32[2048,8], index: 3, kind: input, shape index: {}]   ;;  %s4300_s4 = inlined_call_operand.vmem [shape: f32[1,8], index: 4, kind: input, shape index: {}]   ;;  %s4301_s6 = inlined_call_operand.<no memory space> [shape: f32[1,1], index: 6, kind: input, shape index: {}]   ;;  %s4302_s5 = inlined_call_operand.vmem [shape: f32[1,8], index: 5, kind: input, shape index: {}]   ;;  %s4303_s7 = inlined_call_operand.vmem [shape: f32[1,1,8], index: 7, kind: output, shape index: {}]  }
   0x1   :  { %v44_v0 = vld [vmem:[%s4296_s2] sm:$0xf]  ;;  %v2444_v1 = vld [vmem:[%s4296_s2 + $0x4] sm:$0xf]  ;;  %v2478_v2 = vld [vmem:[%s4296_s2 + $0x8] sm:$0xf] }
   0x2   :  { %2411 = vmatpush.msk.msra.mxu0 %vm94_vm0, %v44_v0  ;;  %2445 = vmatpush.msk.msra.mxu1 %vm94_vm0, %v2444_v1  ;;  %v28_v3 = vld [vmem:[%s4297_s0] sm:$0xff]  ;;  %v2428_v4 = vld [vmem:[%s4297_s0 + $0x8] sm:$0xff]  ;;  %v2462_v5 = vld [vmem:[%s4297_s0 + $0x10] sm:$0xff] }
   0x3   :  { %2479 = vmatpush.msk.msra.mxu2 %vm94_vm0, %v2478_v2  ;;  %2412 = vmatmul.msk.f32.vlgmr.msra.gmra.mxu0 %vm45_vm1, %v28_v3  ;;  %v2512_v6 = vld [vmem:[%s4296_s2 + $0xc] sm:$0xf]  ;;  %v2496_v7 = vld [vmem:[%s4297_s0 + $0x30] sm:$0xff]  ;;  %v2463_v9 = vld [vmem:[%s4297_s0 + $0x18] sm:$0xff] }
   0x4   :  { %v2546_v8 = vld [vmem:[%s4296_s2 + $0x10] sm:$0xf]  ;;  %2446 = vmatmul.msk.f32.vlgmr.msra.gmra.mxu1 %vm45_vm1, %v2428_v4  ;;  %2480 = vmatmul.msk.f32.vlgmr.msra.gmra.mxu2 %vm45_vm1, %v2462_v5  ;;  %v2805_v10 = vld [vmem:[%s4297_s0 + $0x38] sm:$0xff]  ;;  %v2464_v11 = vld [vmem:[%s4297_s0 + $0x20] sm:$0xff] }
   0x5   :  { %2513 = vmatpush.msk.msra.mxu3 %vm94_vm0, %v2512_v6  ;;  %2547 = vmatpush.msk.msrb.mxu0 %vm94_vm0, %v2546_v8  ;;  %v2818_v12 = vld [vmem:[%s4297_s0 + $0x40] sm:$0xff]  ;;  %v2465_v13 = vld [vmem:[%s4297_s0 + $0x28] sm:$0xff]  ;;  %v2865_v17 = vld [vmem:[%s4297_s0 + $0x50] sm:$0xff] }
   0x6   :  { %2514 = vmatmul.msk.f32.vlgmr.msra.gmra.mxu3 %vm45_vm1, %v2496_v7  ;;  %v2831_v14 = vld [vmem:[%s4297_s0 + $0x48] sm:$0xff]  ;;  %v2841_v15 = vld [vmem:[%s4297_s0 + $0x60] sm:$0xff]  ;;  %v2872_v18 = vld [vmem:[%s4297_s0 + $0x70] sm:$0xff] }
   0x7   :  { %v2854_v16 = vld [vmem:[%s4297_s0 + $0x68] sm:$0xff]  ;;  %v2883_v19 = vld [vmem:[%s4297_s0 + $0x58] sm:$0xff]  ;;  %v2903_v21 = vld [vmem:[%s4297_s0 + $0x90] sm:$0xff] }
   0x8   :  { %v2890_v20 = vld [vmem:[%s4297_s0 + $0x78] sm:$0xff]  ;;  %v2927_v23 = vld [vmem:[%s4297_s0 + $0x80] sm:$0xff]  ;;  %v2945_v25 = vld [vmem:[%s4297_s0 + $0x88] sm:$0xff] }
   0x9   :  { %v2916_v22 = vld [vmem:[%s4297_s0 + $0x98] sm:$0xff]  ;;  %v2934_v24 = vld [vmem:[%s4297_s0 + $0xa0] sm:$0xff]  ;;  %v2952_v26 = vld [vmem:[%s4297_s0 + $0xa8] sm:$0xff] }
   0xa   :  { %v2614_v27 = vld [vmem:[%s4296_s2 + $0x18] sm:$0xf]  ;;  %v2648_v28 = vld [vmem:[%s4296_s2 + $0x1c] sm:$0xf]  ;;  %v2580_v29 = vld [vmem:[%s4296_s2 + $0x14] sm:$0xf] }
   0xb   :  { %2413 = vmatmul.msk.f32.gmra.mxu0 %vm45_vm1, %v2428_v4  ;;  %2615 = vmatpush.msk.msrb.mxu2 %vm94_vm0, %v2614_v27  ;;  %v2975_v30 = vld [vmem:[%s4297_s0 + $0xc0] sm:$0xff]  ;;  %v2993_v32 = vld [vmem:[%s4297_s0 + $0xc8] sm:$0xff]  ;;  %v3005_v33 = vld [vmem:[%s4297_s0 + $0xb0] sm:$0xff] }
   0xc   :  { %2447 = vmatmul.msk.f32.gmra.mxu1 %vm45_vm1, %v2462_v5  ;;  %2481 = vmatmul.msk.f32.gmra.mxu2 %vm45_vm1, %v2463_v9  ;;  %v2682_v31 = vld [vmem:[%s4296_s2 + $0x20] sm:$0xf]  ;;  %v3012_v34 = vld [vmem:[%s4297_s0 + $0xd0] sm:$0xff]  ;;  %v3023_v35 = vld [vmem:[%s4297_s0 + $0xb8] sm:$0xff] }
   0xd   :  { %2649 = vmatpush.msk.msrb.mxu3 %vm94_vm0, %v2648_v28  ;;  %2581 = vmatpush.msk.msrb.mxu1 %vm94_vm0, %v2580_v29  ;;  %v3030_v36 = vld [vmem:[%s4297_s0 + $0xd8] sm:$0xff] }
   0xe   :  { %2515 = vmatmul.msk.f32.gmra.mxu3 %vm45_vm1, %v2805_v10  ;;  %2683 = vmatpush.msk.msra.mxu0 %vm94_vm0, %v2682_v31 }
  0x13   :  { %2414 = vmatmul.msk.f32.gmra.mxu0 %vm45_vm1, %v2462_v5 }
  0x14   :  { %2448 = vmatmul.msk.f32.gmra.mxu1 %vm45_vm1, %v2463_v9  ;;  %2482 = vmatmul.msk.f32.gmra.mxu2 %vm45_vm1, %v2464_v11 }
  0x16   :  { %2516 = vmatmul.msk.f32.gmra.mxu3 %vm45_vm1, %v2818_v12 }
  0x1b   :  { %2415 = vmatmul.msk.f32.gmra.mxu0 %vm45_vm1, %v2463_v9 }
  0x1c   :  { %2449 = vmatmul.msk.f32.gmra.mxu1 %vm45_vm1, %v2464_v11  ;;  %2483 = vmatmul.msk.f32.gmra.mxu2 %vm45_vm1, %v2465_v13 }
  0x1e   :  { %2517 = vmatmul.msk.f32.gmra.mxu3 %vm45_vm1, %v2831_v14 }
  0x23   :  { %2416 = vmatmul.msk.f32.gmra.mxu0 %vm45_vm1, %v2496_v7 }
  0x24   :  { %2450 = vmatmul.msk.f32.gmra.mxu1 %vm45_vm1, %v2805_v10  ;;  %2484 = vmatmul.msk.f32.gmra.mxu2 %vm45_vm1, %v2818_v12 }
  0x26   :  { %2518 = vmatmul.msk.f32.gmra.mxu3 %vm45_vm1, %v2841_v15 }
  0x2b   :  { %2417 = vmatmul.msk.f32.gmra.mxu0 %vm45_vm1, %v2805_v10 }
  0x2c   :  { %2451 = vmatmul.msk.f32.gmra.mxu1 %vm45_vm1, %v2818_v12  ;;  %2485 = vmatmul.msk.f32.gmra.mxu2 %vm45_vm1, %v2831_v14 }
  0x2e   :  { %2519 = vmatmul.msk.f32.gmra.mxu3 %vm45_vm1, %v2854_v16 }
  0x33   :  { %2418 = vmatmul.msk.f32.gmra.mxu0 %vm45_vm1, %v2818_v12 }
  0x34   :  { %2452 = vmatmul.msk.f32.gmra.mxu1 %vm45_vm1, %v2831_v14  ;;  %2486 = vmatmul.msk.f32.gmra.mxu2 %vm45_vm1, %v2865_v17 }
  0x36   :  { %2520 = vmatmul.msk.f32.gmra.mxu3 %vm45_vm1, %v2872_v18 }
  0x3b   :  { %2419 = vmatmul.msk.f32.gmra.mxu0 %vm45_vm1, %v2831_v14 }
  0x3c   :  { %2453 = vmatmul.msk.f32.gmra.mxu1 %vm45_vm1, %v2865_v17  ;;  %2487 = vmatmul.msk.f32.gmra.mxu2 %vm45_vm1, %v2883_v19 }
  0x3e   :  { %2521 = vmatmul.msk.f32.gmra.mxu3 %vm45_vm1, %v2890_v20 }
  0x43   :  { %2420 = vmatmul.msk.f32.gmra.mxu0 %vm45_vm1, %v2841_v15 }
  0x44   :  { %2454 = vmatmul.msk.f32.gmra.mxu1 %vm45_vm1, %v2854_v16  ;;  %2488 = vmatmul.msk.f32.gmra.mxu2 %vm45_vm1, %v2872_v18 }
  0x46   :  { %2522 = vmatmul.msk.f32.gmra.mxu3 %vm45_vm1, %v2903_v21 }
  0x4b   :  { %2421 = vmatmul.msk.f32.gmra.mxu0 %vm45_vm1, %v2854_v16 }
  0x4c   :  { %2455 = vmatmul.msk.f32.gmra.mxu1 %vm45_vm1, %v2872_v18  ;;  %2489 = vmatmul.msk.f32.gmra.mxu2 %vm45_vm1, %v2890_v20 }
  0x4e   :  { %2523 = vmatmul.msk.f32.gmra.mxu3 %vm45_vm1, %v2916_v22 }
  0x53   :  { %2422 = vmatmul.msk.f32.gmra.mxu0 %vm45_vm1, %v2872_v18 }
  0x54   :  { %2456 = vmatmul.msk.f32.gmra.mxu1 %vm45_vm1, %v2890_v20  ;;  %2490 = vmatmul.msk.f32.gmra.mxu2 %vm45_vm1, %v2927_v23 }
  0x56   :  { %2524 = vmatmul.msk.f32.gmra.mxu3 %vm45_vm1, %v2934_v24 }
  0x5b   :  { %2423 = vmatmul.msk.f32.gmra.mxu0 %vm45_vm1, %v2890_v20 }
  0x5c   :  { %2457 = vmatmul.msk.f32.gmra.mxu1 %vm45_vm1, %v2927_v23  ;;  %2491 = vmatmul.msk.f32.gmra.mxu2 %vm45_vm1, %v2945_v25 }
  0x5e   :  { %2525 = vmatmul.msk.f32.gmra.mxu3 %vm45_vm1, %v2952_v26 }
  0x63   :  { %2424 = vmatmul.msk.f32.gmra.mxu0 %vm45_vm1, %v2903_v21 }
  0x64   :  { %2458 = vmatmul.msk.f32.gmra.mxu1 %vm45_vm1, %v2916_v22  ;;  %2492 = vmatmul.msk.f32.gmra.mxu2 %vm45_vm1, %v2934_v24 }
  0x66   :  { %2526 = vmatmul.msk.f32.gmra.mxu3 %vm45_vm1, %v2975_v30 }
  0x6b   :  { %2425 = vmatmul.msk.f32.gmra.mxu0 %vm45_vm1, %v2916_v22 }
  0x6c   :  { %2459 = vmatmul.msk.f32.gmra.mxu1 %vm45_vm1, %v2934_v24  ;;  %2493 = vmatmul.msk.f32.gmra.mxu2 %vm45_vm1, %v2952_v26 }
  0x6e   :  { %2527 = vmatmul.msk.f32.gmra.mxu3 %vm45_vm1, %v2993_v32 }
  0x73   :  { %2426 = vmatmul.msk.f32.gmra.mxu0 %vm45_vm1, %v2934_v24 }
  0x74   :  { %2460 = vmatmul.msk.f32.gmra.mxu1 %vm45_vm1, %v2952_v26  ;;  %2494 = vmatmul.msk.f32.gmra.mxu2 %vm45_vm1, %v3005_v33 }
  0x76   :  { %2528 = vmatmul.msk.f32.gmra.mxu3 %vm45_vm1, %v3012_v34 }
  0x7b   :  { %2427 = vmatmul.msk.f32.gmra.mxu0 %vm45_vm1, %v2952_v26 }
  0x7c   :  { %2461 = vmatmul.msk.f32.gmra.mxu1 %vm45_vm1, %v3005_v33  ;;  %2495 = vmatmul.msk.f32.gmra.mxu2 %vm45_vm1, %v3023_v35 }
  0x7e   :  { %2529 = vmatmul.msk.f32.gmra.mxu3 %vm45_vm1, %v3030_v36 }
  0x80   :  { %v115_v37 = vpop.f32.mrf.mxu0 }
  0x81   :  { %v266_v38 = vpop.f32.mrf.mxu1 }
  0x82   :  { %v330_v39 = vadd.f32 %v266_v38, %v115_v37 }
  0x83   :  { %2548 = vmatmul.msk.f32.vlgmr.msrb.gmra.mxu0 %vm45_vm1, %v2805_v10 }
  0x84   :  { %2616 = vmatmul.msk.f32.vlgmr.msrb.gmra.mxu2 %vm45_vm1, %v2841_v15  ;;  %2582 = vmatmul.msk.f32.vlgmr.msrb.gmra.mxu1 %vm45_vm1, %v2818_v12 }
  0x86   :  { %2650 = vmatmul.msk.f32.vlgmr.msrb.gmra.mxu3 %vm45_vm1, %v2854_v16 }
  0x87   :  { %v449_v40 = vpop.f32.mrf.mxu2 }
  0x88   :  { %v513_v41 = vadd.f32 %v449_v40, %v330_v39  ;;  %v118_v42 = vpop.f32.mrf.mxu0 }
  0x89   :  { %v269_v43 = vpop.f32.mrf.mxu1  ;;  %v632_v44 = vpop.f32.mrf.mxu3 }
  0x8a   :  { %v3046_v45 = vadd.f32 %v632_v44, %v513_v41  ;;  %v331_v46 = vadd.f32 %v269_v43, %v118_v42 }
  0x8b   :  { %2549 = vmatmul.msk.f32.gmra.mxu0 %vm45_vm1, %v2818_v12 }
  0x8c   :  { %2617 = vmatmul.msk.f32.gmra.mxu2 %vm45_vm1, %v2854_v16  ;;  %2583 = vmatmul.msk.f32.gmra.mxu1 %vm45_vm1, %v2831_v14 }
  0x8e   :  { %2651 = vmatmul.msk.f32.gmra.mxu3 %vm45_vm1, %v2872_v18 }
  0x8f   :  { %v452_v47 = vpop.f32.mrf.mxu2 }
  0x90   :  { %v514_v48 = vadd.f32 %v452_v47, %v331_v46  ;;  %v121_v49 = vpop.f32.mrf.mxu0 }
  0x91   :  { %v272_v50 = vpop.f32.mrf.mxu1  ;;  %v635_v51 = vpop.f32.mrf.mxu3 }
  0x92   :  { %v3056_v52 = vadd.f32 %v635_v51, %v514_v48  ;;  %v332_v53 = vadd.f32 %v272_v50, %v121_v49 }
  0x93   :  { %2550 = vmatmul.msk.f32.gmra.mxu0 %vm45_vm1, %v2831_v14 }
  0x94   :  { %2618 = vmatmul.msk.f32.gmra.mxu2 %vm45_vm1, %v2872_v18  ;;  %2584 = vmatmul.msk.f32.gmra.mxu1 %vm45_vm1, %v2865_v17 }
  0x96   :  { %2652 = vmatmul.msk.f32.gmra.mxu3 %vm45_vm1, %v2890_v20 }
  0x97   :  { %v455_v54 = vpop.f32.mrf.mxu2 }
  0x98   :  { %v515_v55 = vadd.f32 %v455_v54, %v332_v53  ;;  %v124_v56 = vpop.f32.mrf.mxu0 }
  0x99   :  { %v275_v57 = vpop.f32.mrf.mxu1  ;;  %v638_v58 = vpop.f32.mrf.mxu3 }
  0x9a   :  { %v3066_v59 = vadd.f32 %v638_v58, %v515_v55  ;;  %v333_v60 = vadd.f32 %v275_v57, %v124_v56  ;;  %v3175_v56 = vld [vmem:[%s4297_s0 + $0xe0] sm:$0xff] }
  0x9b   :  { %2551 = vmatmul.msk.f32.gmra.mxu0 %vm45_vm1, %v2865_v17 }
  0x9c   :  { %2619 = vmatmul.msk.f32.gmra.mxu2 %vm45_vm1, %v2890_v20  ;;  %2585 = vmatmul.msk.f32.gmra.mxu1 %vm45_vm1, %v2883_v19 }
  0x9e   :  { %2653 = vmatmul.msk.f32.gmra.mxu3 %vm45_vm1, %v2927_v23 }
  0x9f   :  { %v458_v61 = vpop.f32.mrf.mxu2 }
  0xa0   :  { %v516_v62 = vadd.f32 %v458_v61, %v333_v60  ;;  %v127_v63 = vpop.f32.mrf.mxu0 }
  0xa1   :  { %v278_v0 = vpop.f32.mrf.mxu1  ;;  %v641_v1 = vpop.f32.mrf.mxu3 }
  0xa2   :  { %v3076_v2 = vadd.f32 %v641_v1, %v516_v62  ;;  %v334_v3 = vadd.f32 %v278_v0, %v127_v63  ;;  %v2610_v62 = vld [vmem:[%s4297_s0 + $0xf0] sm:$0xff]  ;;  %v2644_v63 = vld [vmem:[%s4297_s0 + $0xf8] sm:$0xff] }
  0xa3   :  { %2552 = vmatmul.msk.f32.gmra.mxu0 %vm45_vm1, %v2854_v16 }
  0xa4   :  { %2620 = vmatmul.msk.f32.gmra.mxu2 %vm45_vm1, %v2903_v21  ;;  %2586 = vmatmul.msk.f32.gmra.mxu1 %vm45_vm1, %v2872_v18 }
  0xa6   :  { %2654 = vmatmul.msk.f32.gmra.mxu3 %vm45_vm1, %v2916_v22 }
  0xa7   :  { %v461_v4 = vpop.f32.mrf.mxu2 }
  0xa8   :  { %v517_v5 = vadd.f32 %v461_v4, %v334_v3  ;;  %v130_v6 = vpop.f32.mrf.mxu0 }
  0xa9   :  { %v281_v7 = vpop.f32.mrf.mxu1  ;;  %v644_v8 = vpop.f32.mrf.mxu3 }
  0xaa   :  { %v3086_v9 = vadd.f32 %v644_v8, %v517_v5  ;;  %v335_v10 = vadd.f32 %v281_v7, %v130_v6 }
  0xab   :  { %2553 = vmatmul.msk.f32.gmra.mxu0 %vm45_vm1, %v2872_v18 }
  0xac   :  { %2621 = vmatmul.msk.f32.gmra.mxu2 %vm45_vm1, %v2916_v22  ;;  %2587 = vmatmul.msk.f32.gmra.mxu1 %vm45_vm1, %v2890_v20 }
  0xae   :  { %2655 = vmatmul.msk.f32.gmra.mxu3 %vm45_vm1, %v2934_v24 }
  0xaf   :  { %v464_v11 = vpop.f32.mrf.mxu2 }
  0xb0   :  { %v518_v12 = vadd.f32 %v464_v11, %v335_v10  ;;  %v133_v13 = vpop.f32.mrf.mxu0 }
  0xb1   :  { %v284_v14 = vpop.f32.mrf.mxu1  ;;  %v647_v15 = vpop.f32.mrf.mxu3 }
  0xb2   :  { %v3096_v16 = vadd.f32 %v647_v15, %v518_v12  ;;  %v336_v17 = vadd.f32 %v284_v14, %v133_v13  ;;  %v3226_v13 = vld [vmem:[%s4297_s0 + $0x108] sm:$0xff] }
  0xb3   :  { %2554 = vmatmul.msk.f32.gmra.mxu0 %vm45_vm1, %v2890_v20 }
  0xb4   :  { %2622 = vmatmul.msk.f32.gmra.mxu2 %vm45_vm1, %v2934_v24  ;;  %2588 = vmatmul.msk.f32.gmra.mxu1 %vm45_vm1, %v2927_v23 }
  0xb6   :  { %2656 = vmatmul.msk.f32.gmra.mxu3 %vm45_vm1, %v2952_v26 }
  0xb7   :  { %v467_v19 = vpop.f32.mrf.mxu2 }
  0xb8   :  { %v519_v21 = vadd.f32 %v467_v19, %v336_v17  ;;  %v136_v27 = vpop.f32.mrf.mxu0 }
  0xb9   :  { %v287_v28 = vpop.f32.mrf.mxu1  ;;  %v650_v29 = vpop.f32.mrf.mxu3 }
  0xba   :  { %v3106_v31 = vadd.f32 %v650_v29, %v519_v21  ;;  %v337_v37 = vadd.f32 %v287_v28, %v136_v27  ;;  %v3237_v27 = vld [vmem:[%s4297_s0 + $0xe8] sm:$0xff] }
  0xbb   :  { %2555 = vmatmul.msk.f32.gmra.mxu0 %vm45_vm1, %v2927_v23 }
  0xbc   :  { %2623 = vmatmul.msk.f32.gmra.mxu2 %vm45_vm1, %v2952_v26  ;;  %2589 = vmatmul.msk.f32.gmra.mxu1 %vm45_vm1, %v2945_v25 }
  0xbe   :  { %2657 = vmatmul.msk.f32.gmra.mxu3 %vm45_vm1, %v3005_v33 }
  0xbf   :  { %v470_v38 = vpop.f32.mrf.mxu2 }
  0xc0   :  { %v520_v39 = vadd.f32 %v470_v38, %v337_v37  ;;  %v3116_v40 = vpop.f32.mrf.mxu0  ;;  %v3246_v37 = vld [vmem:[%s4297_s0 + $0x110] sm:$0xff] }
  0xc1   :  { %v3118_v41 = vpop.f32.mrf.mxu1  ;;  %v653_v42 = vpop.f32.mrf.mxu3 }
  0xc2   :  { %v3120_v43 = vadd.f32 %v653_v42, %v520_v39 }
  0xc3   :  { %2556 = vmatmul.msk.f32.gmra.mxu0 %vm45_vm1, %v2916_v22 }
  0xc4   :  { %2624 = vmatmul.msk.f32.gmra.mxu2 %vm45_vm1, %v2975_v30  ;;  %2590 = vmatmul.msk.f32.gmra.mxu1 %vm45_vm1, %v2934_v24 }
  0xc6   :  { %2658 = vmatmul.msk.f32.gmra.mxu3 %vm45_vm1, %v2993_v32 }
  0xc7   :  { %v3130_v44 = vpop.f32.mrf.mxu2 }
  0xc8   :  { %v3132_v46 = vpop.f32.mrf.mxu0 }
  0xc9   :  { %v3134_v47 = vpop.f32.mrf.mxu1  ;;  %v3136_v48 = vpop.f32.mrf.mxu3 }
  0xcb   :  { %2557 = vmatmul.msk.f32.gmra.mxu0 %vm45_vm1, %v2934_v24 }
  0xcc   :  { %2625 = vmatmul.msk.f32.gmra.mxu2 %vm45_vm1, %v2993_v32  ;;  %2591 = vmatmul.msk.f32.gmra.mxu1 %vm45_vm1, %v2952_v26 }
  0xce   :  { %2659 = vmatmul.msk.f32.gmra.mxu3 %vm45_vm1, %v3012_v34 }
  0xcf   :  { %v3146_v22 = vpop.f32.mrf.mxu2 }
  0xd0   :  { %v3148_v30 = vpop.f32.mrf.mxu0 }
  0xd1   :  { %v3150_v49 = vpop.f32.mrf.mxu1  ;;  %v3152_v50 = vpop.f32.mrf.mxu3 }
  0xd3   :  { %2558 = vmatmul.msk.f32.gmra.mxu0 %vm45_vm1, %v2952_v26 }
  0xd4   :  { %2626 = vmatmul.msk.f32.gmra.mxu2 %vm45_vm1, %v3012_v34  ;;  %2592 = vmatmul.msk.f32.gmra.mxu1 %vm45_vm1, %v3005_v33 }
  0xd6   :  { %2660 = vmatmul.msk.f32.gmra.mxu3 %vm45_vm1, %v3030_v36 }
  0xd7   :  { %v3162_v51 = vpop.f32.mrf.mxu2 }
  0xd8   :  { %v3164_v53 = vpop.f32.mrf.mxu0 }
  0xd9   :  { %v3166_v54 = vpop.f32.mrf.mxu1  ;;  %v3168_v55 = vpop.f32.mrf.mxu3 }
  0xdb   :  { %2559 = vmatmul.msk.f32.gmra.mxu0 %vm45_vm1, %v3005_v33 }
  0xdc   :  { %2627 = vmatmul.msk.f32.gmra.mxu2 %vm45_vm1, %v3030_v36  ;;  %2593 = vmatmul.msk.f32.gmra.mxu1 %vm45_vm1, %v3023_v35 }
  0xde   :  { %2661 = vmatmul.msk.f32.gmra.mxu3 %vm45_vm1, %v3175_v56 }
  0xdf   :  { %v3183_v57 = vpop.f32.mrf.mxu2 }
  0xe0   :  { %v3185_v58 = vpop.f32.mrf.mxu0 }
  0xe1   :  { %v3187_v60 = vpop.f32.mrf.mxu1  ;;  %v3189_v61 = vpop.f32.mrf.mxu3 }
  0xe3   :  { %2560 = vmatmul.msk.f32.gmra.mxu0 %vm45_vm1, %v2993_v32  ;;  %v3212_v32 = vld [vmem:[%s4297_s0 + $0x100] sm:$0xff] }
  0xe4   :  { %2628 = vmatmul.msk.f32.gmra.mxu2 %vm45_vm1, %v2610_v62  ;;  %2594 = vmatmul.msk.f32.gmra.mxu1 %vm45_vm1, %v3012_v34 }
  0xe6   :  { %2662 = vmatmul.msk.f32.gmra.mxu3 %vm45_vm1, %v2644_v63 }
  0xe7   :  { %v3203_v0 = vpop.f32.mrf.mxu2 }
  0xe8   :  { %v154_v1 = vpop.f32.mrf.mxu0 }
  0xe9   :  { %v305_v3 = vpop.f32.mrf.mxu1  ;;  %v3205_v4 = vpop.f32.mrf.mxu3 }
  0xea   :  { %v343_v5 = vadd.f32 %v305_v3, %v154_v1 }
  0xeb   :  { %2561 = vmatmul.msk.f32.gmra.mxu0 %vm45_vm1, %v3012_v34 }
  0xec   :  { %2629 = vmatmul.msk.f32.gmra.mxu2 %vm45_vm1, %v2644_v63  ;;  %2595 = vmatmul.msk.f32.gmra.mxu1 %vm45_vm1, %v3030_v36 }
  0xee   :  { %2663 = vmatmul.msk.f32.gmra.mxu3 %vm45_vm1, %v3212_v32 }
  0xef   :  { %v488_v6 = vpop.f32.mrf.mxu2 }
  0xf0   :  { %v526_v7 = vadd.f32 %v488_v6, %v343_v5  ;;  %v157_v8 = vpop.f32.mrf.mxu0 }
  0xf1   :  { %v308_v10 = vpop.f32.mrf.mxu1  ;;  %v671_v11 = vpop.f32.mrf.mxu3 }
  0xf2   :  { %v3219_v12 = vadd.f32 %v671_v11, %v526_v7  ;;  %v344_v14 = vadd.f32 %v308_v10, %v157_v8  ;;  %v1833_v10 = vld [vmem:[%s4299_s3 + $0x170] sm:$0xff] }
  0xf3   :  { %2562 = vmatmul.msk.f32.gmra.mxu0 %vm45_vm1, %v3030_v36  ;;  %v1801_v11 = vld [vmem:[%s4299_s3 + $0x70] sm:$0xff] }
  0xf4   :  { %2630 = vmatmul.msk.f32.gmra.mxu2 %vm45_vm1, %v3212_v32  ;;  %2596 = vmatmul.msk.f32.gmra.mxu1 %vm45_vm1, %v3175_v56 }
  0xf6   :  { %2664 = vmatmul.msk.f32.gmra.mxu3 %vm45_vm1, %v3226_v13 }
  0xf7   :  { %v491_v15 = vpop.f32.mrf.mxu2 }
  0xf8   :  { %v527_v17 = vadd.f32 %v491_v15, %v344_v14  ;;  %v160_v19 = vpop.f32.mrf.mxu0  ;;  %v1832_v15 = vld [vmem:[%s4299_s3 + $0x168] sm:$0xff] }
  0xf9   :  { %v674_v21 = vpop.f32.mrf.mxu3  ;;  %v311_v29 = vpop.f32.mrf.mxu1 }
  0xfa   :  { %v3239_v28 = vadd.f32 %v674_v21, %v527_v17  ;;  %v345_v38 = vadd.f32 %v311_v29, %v160_v19  ;;  %v1800_v17 = vld [vmem:[%s4299_s3 + $0x68] sm:$0xff]  ;;  %v1798_v19 = vld [vmem:[%s4299_s3 + $0x58] sm:$0xff]  ;;  %v1815_v21 = vld [vmem:[%s4299_s3 + $0xe0] sm:$0xff] }
  0xfb   :  { %2563 = vmatmul.msk.f32.gmra.mxu0 %vm45_vm1, %v3175_v56  ;;  %v1797_v29 = vld [vmem:[%s4299_s3 + $0x50] sm:$0xff] }
  0xfc   :  { %2631 = vmatmul.msk.f32.gmra.mxu2 %vm45_vm1, %v3226_v13  ;;  %2597 = vmatmul.msk.f32.gmra.mxu1 %vm45_vm1, %v3237_v27 }
  0xfe   :  { %2665 = vmatmul.msk.f32.gmra.mxu3 %vm45_vm1, %v3246_v37 }
  0xff   :  { %v494_v39 = vpop.f32.mrf.mxu2 }
 0x100   :  { %v528_v42 = vadd.f32 %v494_v39, %v345_v38  ;;  %v3254_v62 = vpop.f32.mrf.mxu0  ;;  %v1796_v39 = vld [vmem:[%s4299_s3 + $0x48] sm:$0xff] }
 0x101   :  { %v677_v63 = vpop.f32.mrf.mxu3 }
 0x102   :  { %v3256_v1 = vadd.f32 %v677_v63, %v528_v42  ;;  %v1795_v42 = vld [vmem:[%s4299_s3 + $0x40] sm:$0xff]  ;;  %v1794_v63 = vld [vmem:[%s4299_s3 + $0x38] sm:$0xff] }
 0x103   :  { %2684 = vmatmul.msk.f32.vlgmr.msra.gmra.mxu0 %vm45_vm1, %v2872_v18  ;;  %v1818_v18 = vld [vmem:[%s4299_s3 + $0xf8] sm:$0xff] }
 0x104   :  { %2067 = vmatpush.msra.mxu2 %v1818_v18  ;;  %v1814_v18 = vld [vmem:[%s4299_s3 + $0xd8] sm:$0xff] }
 0x108   :  { %v3260_v3 = vpop.f32.mrf.mxu0 }
 0x10b   :  { %2685 = vmatmul.msk.f32.gmra.mxu0 %vm45_vm1, %v2890_v20 }
 0x110   :  { %v3264_v5 = vpop.f32.mrf.mxu0 }
 0x113   :  { %2686 = vmatmul.msk.f32.gmra.mxu0 %vm45_vm1, %v2927_v23  ;;  %v1834_v23 = vld [vmem:[%s4299_s3 + $0x178] sm:$0xff] }
 0x114   :  { %2087 = vmatpush.msra.mxu3 %v1834_v23  ;;  %v1793_v23 = vld [vmem:[%s4299_s3 + $0x30] sm:$0xff] }
 0x116   :  { %2088 = vmatpush.msra.mxu3 %v1833_v10  ;;  %v1792_v10 = vld [vmem:[%s4299_s3 + $0x28] sm:$0xff] }
 0x118   :  { %v3268_v6 = vpop.f32.mrf.mxu0  ;;  %2089 = vmatpush.msra.mxu3 %v1832_v15  ;;  %v1811_v15 = vld [vmem:[%s4299_s3 + $0xc0] sm:$0xff] }
 0x11b   :  { %2687 = vmatmul.msk.f32.gmra.mxu0 %vm45_vm1, %v2945_v25  ;;  %v1802_v25 = vld [vmem:[%s4299_s3 + $0x78] sm:$0xff] }
 0x11c   :  { %2047 = vmatpush.msra.mxu1 %v1802_v25  ;;  %v1813_v25 = vld [vmem:[%s4299_s3 + $0xd0] sm:$0xff] }
 0x11e   :  { %2048 = vmatpush.msra.mxu1 %v1801_v11  ;;  %v1812_v11 = vld [vmem:[%s4299_s3 + $0xc8] sm:$0xff] }
 0x120   :  { %v3272_v7 = vpop.f32.mrf.mxu0  ;;  %2049 = vmatpush.msra.mxu1 %v1800_v17  ;;  %v1790_v17 = vld [vmem:[%s4299_s3 + $0x18] sm:$0xff] }
 0x123   :  { %2688 = vmatmul.msk.f32.gmra.mxu0 %vm45_vm1, %v2934_v24  ;;  %v1817_v24 = vld [vmem:[%s4299_s3 + $0xf0] sm:$0xff] }
 0x124   :  { %2068 = vmatpush.msra.mxu2 %v1817_v24  ;;  %v1830_v24 = vld [vmem:[%s4299_s3 + $0x158] sm:$0xff] }
 0x128   :  { %v3279_v20 = vpop.f32.mrf.mxu0 }
 0x12b   :  { %2689 = vmatmul.msk.f32.gmra.mxu0 %vm45_vm1, %v2952_v26  ;;  %v1816_v26 = vld [vmem:[%s4299_s3 + $0xe8] sm:$0xff] }
 0x12c   :  { %2069 = vmatpush.msra.mxu2 %v1816_v26  ;;  %v1791_v26 = vld [vmem:[%s4299_s3 + $0x20] sm:$0xff] }
 0x12e   :  { %2070 = vmatpush.msra.mxu2 %v1815_v21  ;;  %v1829_v21 = vld [vmem:[%s4299_s3 + $0x150] sm:$0xff] }
 0x130   :  { %v3292_v8 = vpop.f32.mrf.mxu0  ;;  %2071 = vmatpush.msra.mxu2 %v1814_v18  ;;  %v1807_v18 = vld [vmem:[%s4299_s3 + $0xa0] sm:$0xff] }
 0x132   :  { %2072 = vmatpush.msra.mxu2 %v1813_v25  ;;  %v1850_v25 = vld [vmem:[%s4299_s3 + $0x1f8] sm:$0xff] }
 0x133   :  { %2690 = vmatmul.msk.f32.gmra.mxu0 %vm45_vm1, %v3005_v33  ;;  %v1799_v33 = vld [vmem:[%s4299_s3 + $0x60] sm:$0xff] }
 0x134   :  { %2050 = vmatpush.msra.mxu1 %v1799_v33  ;;  %2073 = vmatpush.msra.mxu2 %v1812_v11  ;;  %v1810_v33 = vld [vmem:[%s4299_s3 + $0xb8] sm:$0xff]  ;;  %v1849_v11 = vld [vmem:[%s4299_s3 + $0x1f0] sm:$0xff] }
 0x136   :  { %2051 = vmatpush.msra.mxu1 %v1798_v19  ;;  %2074 = vmatpush.msra.mxu2 %v1811_v15  ;;  %v1789_v19 = vld [vmem:[%s4299_s3 + $0x10] sm:$0xff]  ;;  %v1848_v15 = vld [vmem:[%s4299_s3 + $0x1e8] sm:$0xff] }
 0x138   :  { %v3305_v14 = vpop.f32.mrf.mxu0  ;;  %2052 = vmatpush.msra.mxu1 %v1797_v29  ;;  %2075 = vmatpush.msra.mxu2 %v1810_v33 }
 0x13a   :  { %2053 = vmatpush.msra.mxu1 %v1796_v39  ;;  %v1808_v39 = vld [vmem:[%s4299_s3 + $0xa8] sm:$0xff] }
 0x13b   :  { %2691 = vmatmul.msk.f32.gmra.mxu0 %vm45_vm1, %v3023_v35  ;;  %v1831_v35 = vld [vmem:[%s4299_s3 + $0x160] sm:$0xff] }
 0x13c   :  { %2090 = vmatpush.msra.mxu3 %v1831_v35  ;;  %2054 = vmatpush.msra.mxu1 %v1795_v42  ;;  %v1788_v35 = vld [vmem:[%s4299_s3 + $0x8] sm:$0xff] }
 0x13d   :  { %v1828_v42 = vld [vmem:[%s4299_s3 + $0x148] sm:$0xff] }
 0x13e   :  { %2055 = vmatpush.msra.mxu1 %v1794_v63  ;;  %2091 = vmatpush.msra.mxu3 %v1830_v24  ;;  %v1787_v63 = vld [vmem:[%s4299_s3] sm:$0xff]  ;;  %v1806_v24 = vld [vmem:[%s4299_s3 + $0x98] sm:$0xff] }
 0x140   :  { %v3327_v38 = vpop.f32.mrf.mxu0  ;;  %2056 = vmatpush.msra.mxu1 %v1793_v23  ;;  %2092 = vmatpush.msra.mxu3 %v1829_v21  ;;  %v1827_v23 = vld [vmem:[%s4299_s3 + $0x140] sm:$0xff] }
 0x141   :  { %v1847_v21 = vld [vmem:[%s4299_s3 + $0x1e0] sm:$0xff] }
 0x142   :  { %2057 = vmatpush.msra.mxu1 %v1792_v10  ;;  %2093 = vmatpush.msra.mxu3 %v1828_v42  ;;  %v1826_v10 = vld [vmem:[%s4299_s3 + $0x138] sm:$0xff]  ;;  %v1823_v42 = vld [vmem:[%s4299_s3 + $0x120] sm:$0xff] }
 0x143   :  { %2692 = vmatmul.msk.f32.gmra.mxu0 %vm45_vm1, %v3012_v34 }
 0x144   :  { %2058 = vmatpush.msra.mxu1 %v1791_v26  ;;  %2094 = vmatpush.msra.mxu3 %v1827_v23  ;;  %v1825_v26 = vld [vmem:[%s4299_s3 + $0x130] sm:$0xff]  ;;  %v1822_v23 = vld [vmem:[%s4299_s3 + $0x118] sm:$0xff] }
 0x146   :  { %2059 = vmatpush.msra.mxu1 %v1790_v17  ;;  %2095 = vmatpush.msra.mxu3 %v1826_v10  ;;  %v3429_v17 = vpop.f32.mrf.mxu1  ;;  %v1821_v10 = vld [vmem:[%s4299_s3 + $0x110] sm:$0xff] }
 0x148   :  { %v3352_v34 = vpop.f32.mrf.mxu0  ;;  %2060 = vmatpush.msra.mxu1 %v1789_v19  ;;  %2096 = vmatpush.msra.mxu3 %v1825_v26  ;;  %v1804_v19 = vld [vmem:[%s4299_s3 + $0x88] sm:$0xff] }
 0x14a   :  { %2061 = vmatpush.msra.mxu1 %v1788_v35  ;;  %v3442_v35 = vpop.f32.mrf.mxu2 }
 0x14b   :  { %2693 = vmatmul.msk.f32.gmra.mxu0 %vm45_vm1, %v3030_v36  ;;  %v1809_v36 = vld [vmem:[%s4299_s3 + $0xb0] sm:$0xff] }
 0x14c   :  { %2076 = vmatpush.msra.mxu2 %v1809_v36  ;;  %2062 = vmatpush.msra.mxu1 %v1787_v63  ;;  %v1824_v36 = vld [vmem:[%s4299_s3 + $0x128] sm:$0xff]  ;;  %v1846_v63 = vld [vmem:[%s4299_s3 + $0x1d8] sm:$0xff] }
 0x14d   :  { %2097 = vmatpush.msra.mxu3 %v1824_v36  ;;  %v1863_v36 = vld [vmem:[%s4299_s3 + $0x260] sm:$0xff] }
 0x14e   :  { %2077 = vmatpush.msra.mxu2 %v1808_v39  ;;  %2107 = vmatpush.msrb.mxu1 %v1850_v25  ;;  %v1803_v39 = vld [vmem:[%s4299_s3 + $0x80] sm:$0xff]  ;;  %v1845_v25 = vld [vmem:[%s4299_s3 + $0x1d0] sm:$0xff] }
 0x14f   :  { %2098 = vmatpush.msra.mxu3 %v1823_v42  ;;  %v1842_v42 = vld [vmem:[%s4299_s3 + $0x1b8] sm:$0xff] }
 0x150   :  { %v3386_v29 = vpop.f32.mrf.mxu0  ;;  %2078 = vmatpush.msra.mxu2 %v1807_v18  ;;  %2108 = vmatpush.msrb.mxu1 %v1849_v11  ;;  %v1866_v18 = vld [vmem:[%s4299_s3 + $0x278] sm:$0xff]  ;;  %v1844_v11 = vld [vmem:[%s4299_s3 + $0x1c8] sm:$0xff] }
 0x151   :  { %2099 = vmatpush.msra.mxu3 %v1822_v23 }
 0x152   :  { %2079 = vmatpush.msra.mxu2 %v1806_v24  ;;  %2109 = vmatpush.msrb.mxu1 %v1848_v15  ;;  %v3467_v24 = vpop.f32.mrf.mxu3  ;;  %v1820_v15 = vld [vmem:[%s4299_s3 + $0x108] sm:$0xff]  ;;  %v3505_v23 = vpop.f32.mrf.mxu2 }
 0x153   :  { %2694 = vmatmul.msk.f32.gmra.mxu0 %vm45_vm1, %v3175_v56  ;;  %v1805_v56 = vld [vmem:[%s4299_s3 + $0x90] sm:$0xff]  ;;  %2100 = vmatpush.msra.mxu3 %v1821_v10  ;;  %v1994_v10 = vld [vmem:[%s4299_s3 + $0x678] sm:$0xff] }
 0x154   :  { %2080 = vmatpush.msra.mxu2 %v1805_v56  ;;  %2110 = vmatpush.msrb.mxu1 %v1847_v21  ;;  %v1864_v56 = vld [vmem:[%s4299_s3 + $0x268] sm:$0xff]  ;;  %v3489_v21 = vpop.f32.mrf.mxu1 }
 0x155   :  { %2101 = vmatpush.msra.mxu3 %v1820_v15  ;;  %v1880_v15 = vld [vmem:[%s4299_s3 + $0x2e8] sm:$0xff]  ;;  %2287 = vmatpush.msrb.mxu0 %v1994_v10  ;;  %v1857_v10 = vld [vmem:[%s4299_s3 + $0x230] sm:$0xff] }
 0x156   :  { %2081 = vmatpush.msra.mxu2 %v1804_v19  ;;  %2111 = vmatpush.msrb.mxu1 %v1846_v63  ;;  %v1843_v19 = vld [vmem:[%s4299_s3 + $0x1c0] sm:$0xff]  ;;  %v1862_v63 = vld [vmem:[%s4299_s3 + $0x258] sm:$0xff] }
 0x158   :  { %v3431_v33 = vpop.f32.mrf.mxu0  ;;  %2082 = vmatpush.msra.mxu2 %v1803_v39  ;;  %2112 = vmatpush.msrb.mxu1 %v1845_v25  ;;  %v1819_v39 = vld [vmem:[%s4299_s3 + $0x100] sm:$0xff]  ;;  %v1861_v25 = vld [vmem:[%s4299_s3 + $0x250] sm:$0xff] }
 0x159   :  { %2102 = vmatpush.msra.mxu3 %v1819_v39 }
 0x15a   :  { %2127 = vmatpush.msrb.mxu2 %v1866_v18  ;;  %2113 = vmatpush.msrb.mxu1 %v1844_v11  ;;  %v1882_v18 = vld [vmem:[%s4299_s3 + $0x2f8] sm:$0xff]  ;;  %v1840_v11 = vld [vmem:[%s4299_s3 + $0x1a8] sm:$0xff] }
 0x15b   :  { %2695 = vmatmul.msk.f32.gmra.mxu0 %vm45_vm1, %v3237_v27  ;;  %v1865_v27 = vld [vmem:[%s4299_s3 + $0x270] sm:$0xff]  ;;  %2147 = vmatpush.msrb.mxu3 %v1882_v18  ;;  %v1879_v18 = vld [vmem:[%s4299_s3 + $0x2e0] sm:$0xff] }
 0x15c   :  { %2128 = vmatpush.msrb.mxu2 %v1865_v27  ;;  %2114 = vmatpush.msrb.mxu1 %v1843_v19  ;;  %v1881_v27 = vld [vmem:[%s4299_s3 + $0x2f0] sm:$0xff]  ;;  %v3528_v19 = vpop.f32.mrf.mxu3 }
 0x15d   :  { %2148 = vmatpush.msrb.mxu3 %v1881_v27  ;;  %v3553_v27 = vpop.f32.mrf.mxu1 }
 0x15e   :  { %2129 = vmatpush.msrb.mxu2 %v1864_v56  ;;  %2115 = vmatpush.msrb.mxu1 %v1842_v42  ;;  %v1860_v56 = vld [vmem:[%s4299_s3 + $0x248] sm:$0xff]  ;;  %v1839_v42 = vld [vmem:[%s4299_s3 + $0x1a0] sm:$0xff] }
 0x15f   :  { %2149 = vmatpush.msrb.mxu3 %v1880_v15  ;;  %v1993_v15 = vld [vmem:[%s4299_s3 + $0x670] sm:$0xff] }
 0x160   :  { %v3478_v26 = vpop.f32.mrf.mxu0  ;;  %2130 = vmatpush.msrb.mxu2 %v1863_v36  ;;  %2288 = vmatpush.msrb.mxu0 %v1993_v15  ;;  %v879_v15 = vadd.f32 %v3254_v62, %v3046_v45  ;;  %v1852_v45 = vld [vmem:[%s4299_s3 + $0x208] sm:$0xff] }
 0x161   :  { %2150 = vmatpush.msrb.mxu3 %v1879_v18  ;;  %v1872_v62 = vld [vmem:[%s4299_s3 + $0x2a8] sm:$0xff] }
 0x162   :  { %2131 = vmatpush.msrb.mxu2 %v1862_v63  ;;  %v1859_v63 = vld [vmem:[%s4299_s3 + $0x240] sm:$0xff] }
 0x163   :  { %2696 = vmatmul.msk.f32.gmra.mxu0 %vm45_vm1, %v3212_v32  ;;  %v1841_v32 = vld [vmem:[%s4299_s3 + $0x1b0] sm:$0xff] }
 0x164   :  { %2116 = vmatpush.msrb.mxu1 %v1841_v32  ;;  %2132 = vmatpush.msrb.mxu2 %v1861_v25  ;;  %v1858_v32 = vld [vmem:[%s4299_s3 + $0x238] sm:$0xff] }
 0x165   :  { %v1878_v25 = vld [vmem:[%s4299_s3 + $0x2d8] sm:$0xff] }
 0x166   :  { %2117 = vmatpush.msrb.mxu1 %v1840_v11  ;;  %2133 = vmatpush.msrb.mxu2 %v1860_v56  ;;  %v1877_v11 = vld [vmem:[%s4299_s3 + $0x2d0] sm:$0xff]  ;;  %v3564_v56 = vpop.f32.mrf.mxu2 }
 0x167   :  { %2151 = vmatpush.msrb.mxu3 %v1878_v25  ;;  %v1855_v25 = vld [vmem:[%s4299_s3 + $0x220] sm:$0xff] }
 0x168   :  { %v854_v36 = vpop.f32.mrf.mxu0  ;;  %2118 = vmatpush.msrb.mxu1 %v1839_v42  ;;  %2134 = vmatpush.msrb.mxu2 %v1859_v63  ;;  %v1856_v42 = vld [vmem:[%s4299_s3 + $0x228] sm:$0xff] }
 0x169   :  { %v3531_v39 = vadd.f32 %v854_v36, %v3219_v12  ;;  %v1838_v12 = vld [vmem:[%s4299_s3 + $0x198] sm:$0xff]  ;;  %v1836_v36 = vld [vmem:[%s4299_s3 + $0x188] sm:$0xff]  ;;  %2152 = vmatpush.msrb.mxu3 %v1877_v11 }
 0x16a   :  { %2119 = vmatpush.msrb.mxu1 %v1838_v12  ;;  %2135 = vmatpush.msrb.mxu2 %v1858_v32  ;;  %v1876_v63 = vld [vmem:[%s4299_s3 + $0x2c8] sm:$0xff]  ;;  %v1835_v32 = vld [vmem:[%s4299_s3 + $0x180] sm:$0xff]  ;;  %v1874_v11 = vld [vmem:[%s4299_s3 + $0x2b8] sm:$0xff] }
 0x16b   :  { %2697 = vmatmul.msk.f32.gmra.mxu0 %vm45_vm1, %v3226_v13  ;;  %v1837_v13 = vld [vmem:[%s4299_s3 + $0x190] sm:$0xff]  ;;  %2153 = vmatpush.msrb.mxu3 %v1876_v63  ;;  %v3611_v63 = vpop.f32.mrf.mxu1 }
 0x16c   :  { %2120 = vmatpush.msrb.mxu1 %v1837_v13  ;;  %2136 = vmatpush.msrb.mxu2 %v1857_v10  ;;  %v3587_v13 = vpop.f32.mrf.mxu3  ;;  %v1875_v10 = vld [vmem:[%s4299_s3 + $0x2c0] sm:$0xff] }
 0x16d   :  { %2154 = vmatpush.msrb.mxu3 %v1875_v10  ;;  %v1062_v10 = vadd.f32 %v3429_v17, %v879_v15  ;;  %v1870_v17 = vld [vmem:[%s4299_s3 + $0x298] sm:$0xff]  ;;  %v880_v15 = vadd.f32 %v3260_v3, %v3056_v52  ;;  %v1868_v52 = vld [vmem:[%s4299_s3 + $0x288] sm:$0xff] }
 0x16e   :  { %2121 = vmatpush.msrb.mxu1 %v1836_v36  ;;  %2137 = vmatpush.msrb.mxu2 %v1856_v42  ;;  %v1853_v36 = vld [vmem:[%s4299_s3 + $0x210] sm:$0xff]  ;;  %v1992_v42 = vld [vmem:[%s4299_s3 + $0x668] sm:$0xff] }
 0x16f   :  { %2155 = vmatpush.msrb.mxu3 %v1874_v11  ;;  %2289 = vmatpush.msrb.mxu0 %v1992_v42  ;;  %v1851_v11 = vld [vmem:[%s4299_s3 + $0x200] sm:$0xff] }
 0x170   :  { %v857_v18 = vpop.f32.mrf.mxu0  ;;  %2122 = vmatpush.msrb.mxu1 %v1835_v32  ;;  %2138 = vmatpush.msrb.mxu2 %v1855_v25  ;;  %v2681_v25 = vld [vmem:[%s4297_s0 + $0x118] sm:$0xff]  ;;  %v1871_v42 = vld [vmem:[%s4299_s3 + $0x2a0] sm:$0xff] }
 0x171   :  { %v3579_v12 = vadd.f32 %v857_v18, %v3239_v28  ;;  %v1854_v28 = vld [vmem:[%s4299_s3 + $0x218] sm:$0xff]  ;;  %v3619_v18 = vpop.f32.mrf.mxu2 }
 0x172   :  { %2139 = vmatpush.msrb.mxu2 %v1854_v28 }
 0x173   :  { %4304 = vst [vmem:[#allocation5_spill] sm:$0xff] %v3579_v12  ;;  %2698 = vmatmul.msk.f32.gmra.mxu0 %vm45_vm1, %v3246_v37  ;;  %v1873_v37 = vld [vmem:[%s4299_s3 + $0x2b0] sm:$0xff]  ;;  %v1245_v12 = vadd.f32 %v3442_v35, %v1062_v10  ;;  %v1991_v35 = vld [vmem:[%s4299_s3 + $0x660] sm:$0xff]  ;;  %v3656_v3 = vpop.f32.mrf.mxu1 }
 0x174   :  { %2140 = vmatpush.msrb.mxu2 %v1853_v36  ;;  %2156 = vmatpush.msrb.mxu3 %v1873_v37  ;;  %v1869_v36 = vld [vmem:[%s4299_s3 + $0x290] sm:$0xff]  ;;  %v1867_v10 = vld [vmem:[%s4299_s3 + $0x280] sm:$0xff] }
 0x175   :  { %2290 = vmatpush.msrb.mxu0 %v1991_v35  ;;  %v1428_v37 = vadd.f32 %v3467_v24, %v1245_v12  ;;  %v2705_v35 = vld [vmem:[%s4298_s1 + $0x1] ss:$0 sm:$0xff] }
 0x176   :  { %2141 = vmatpush.msrb.mxu2 %v1852_v45  ;;  %2157 = vmatpush.msrb.mxu3 %v1872_v62  ;;  %v2704_v45 = vld [vmem:[%s4298_s1] ss:$0 sm:$0xff] }
 0x178   :  { %v860_v32 = vpop.f32.mrf.mxu0  ;;  %2142 = vmatpush.msrb.mxu2 %v1851_v11  ;;  %2158 = vmatpush.msrb.mxu3 %v1871_v42  ;;  %v881_v42 = vadd.f32 %v3264_v5, %v3066_v59 }
 0x179   :  { %v3626_v28 = vadd.f32 %v860_v32, %v3256_v1  ;;  %v3639_v1 = vpop.f32.mrf.mxu3  ;;  %v1063_v32 = vadd.f32 %v3489_v21, %v880_v15  ;;  %v3662_v24 = vpop.f32.mrf.mxu2  ;;  %v1990_v21 = vld [vmem:[%s4299_s3 + $0x658] sm:$0xff] }
 0x17a   :  { %2159 = vmatpush.msrb.mxu3 %v1870_v17  ;;  %2291 = vmatpush.msrb.mxu0 %v1990_v21 }
 0x17b   :  { %2699 = vmatmul.msk.f32.gmra.mxu0 %vm45_vm1, %v2681_v25  ;;  %v1246_v12 = vadd.f32 %v3505_v23, %v1063_v32 }
 0x17c   :  { %2160 = vmatpush.msrb.mxu3 %v1869_v36  ;;  %v1898_v36 = vld [vmem:[%s4299_s3 + $0x378] sm:$0xff] }
 0x17d   :  { %v1429_v23 = vadd.f32 %v3528_v19, %v1246_v12  ;;  %v1896_v19 = vld [vmem:[%s4299_s3 + $0x368] sm:$0xff]  ;;  %v1895_v12 = vld [vmem:[%s4299_s3 + $0x360] sm:$0xff] }
 0x17e   :  { %2161 = vmatpush.msrb.mxu3 %v1868_v52 }
 0x180   :  { %v1547_v62 = vpop.f32.mrf.mxu0  ;;  %2162 = vmatpush.msrb.mxu3 %v1867_v10 }
 0x181   :  { %v1611_v25 = vadd.f32 %v1547_v62, %v1428_v37  ;;  %v3670_v15 = vpop.f32.mrf.mxu3  ;;  %v1897_v37 = vld [vmem:[%s4299_s3 + $0x370] sm:$0xff]  ;;  %v3683_v62 = vpop.f32.mrf.mxu1 }
 0x182   :  { %v3689_v10 = vpop.f32.mrf.mxu2 }
 0x183   :  { %v1646_v11 = vadd.f32 %v2704_v45, %v1611_v25  ;;  %v1064_v45 = vadd.f32 %v3553_v27, %v881_v42  ;;  %v882_v27 = vadd.f32 %v3268_v6, %v3076_v2  ;;  %v1989_v42 = vld [vmem:[%s4299_s3 + $0x650] sm:$0xff]  ;;  %v2706_v2 = vld [vmem:[%s4298_s1 + $0x2] ss:$0 sm:$0xff] }
 0x184   :  { %2292 = vmatpush.msrb.mxu0 %v1989_v42  ;;  %v1890_v42 = vld [vmem:[%s4299_s3 + $0x338] sm:$0xff] }
 0x185   :  { %vm1647_vm2 = vcmp.ge.f32.partialorder %v1646_v11, 0.0  ;;  %v1648_v17 = vmul.f32 0.2, %v1646_v11  ;;  %v1247_v32 = vadd.f32 %v3564_v56, %v1064_v45  ;;  %v1894_v56 = vld [vmem:[%s4299_s3 + $0x358] sm:$0xff]  ;;  %v1912_v45 = vld [vmem:[%s4299_s3 + $0x3e8] sm:$0xff] }
 0x187   :  { %v1649_v59 = vsel %vm1647_vm2, %v1646_v11, %v1648_v17  ;;  %v1914_v17 = vld [vmem:[%s4299_s3 + $0x3f8] sm:$0xff]  ;;  %v1430_v21 = vadd.f32 %v3587_v13, %v1247_v32  ;;  %v1065_v13 = vadd.f32 %v3611_v63, %v882_v27  ;;  %v1891_v63 = vld [vmem:[%s4299_s3 + $0x340] sm:$0xff] }
 0x188   :  { %v1550_v5 = vpop.f32.mrf.mxu0  ;;  %2063 = vmatmul.f32.vlgmr.msra.gmra.mxu1 %v1649_v59  ;;  %v1913_v59 = vld [vmem:[%s4299_s3 + $0x3f0] sm:$0xff] }
 0x189   :  { %v1612_v52 = vadd.f32 %v1550_v5, %v1429_v23  ;;  %2167 = vmatpush.msra.mxu1 %v1898_v36  ;;  %v3709_v36 = vpop.f32.mrf.mxu3  ;;  %v3725_v32 = vpop.f32.mrf.mxu1 }
 0x18b   :  { %v1654_v25 = vadd.f32 %v2705_v35, %v1612_v52  ;;  %2168 = vmatpush.msra.mxu1 %v1897_v37  ;;  %v1893_v35 = vld [vmem:[%s4299_s3 + $0x350] sm:$0xff]  ;;  %v1892_v37 = vld [vmem:[%s4299_s3 + $0x348] sm:$0xff]  ;;  %v1248_v52 = vadd.f32 %v3619_v18, %v1065_v13 }
 0x18c   :  { %v1988_v18 = vld [vmem:[%s4299_s3 + $0x648] sm:$0xff] }
 0x18d   :  { %vm1655_vm3 = vcmp.ge.f32.partialorder %v1654_v25, 0.0  ;;  %v1656_v11 = vmul.f32 0.2, %v1654_v25  ;;  %2169 = vmatpush.msra.mxu1 %v1896_v19  ;;  %2293 = vmatpush.msrb.mxu0 %v1988_v18 }
 0x18f   :  { %v1657_v6 = vsel %vm1655_vm3, %v1654_v25, %v1656_v11  ;;  %2170 = vmatpush.msra.mxu1 %v1895_v12  ;;  %v1911_v25 = vld [vmem:[%s4299_s3 + $0x3e0] sm:$0xff]  ;;  %v883_v12 = vadd.f32 %v3272_v7, %v3086_v9  ;;  %v3738_v11 = vpop.f32.mrf.mxu2  ;;  %v1431_v9 = vadd.f32 %v3639_v1, %v1248_v52  ;;  %v1909_v1 = vld [vmem:[%s4299_s3 + $0x3d0] sm:$0xff]  ;;  %v1928_v52 = vld [vmem:[%s4299_s3 + $0x468] sm:$0xff]  ;;  %vm2378_vm3 = vcmask 64512  }
 0x190   :  { %v1553_v23 = vpop.f32.mrf.mxu0  ;;  %2083 = vmatmul.f32.vlgmr.msra.gmra.mxu2 %v1657_v6  ;;  %v2707_v7 = vld [vmem:[%s4298_s1 + $0x3] ss:$0 sm:$0xff]  ;;  %v1889_v6 = vld [vmem:[%s4299_s3 + $0x330] sm:$0xff] }
 0x191   :  { %v1613_v5 = vadd.f32 %v1553_v23, %v1430_v21  ;;  %2171 = vmatpush.msra.mxu1 %v1894_v56  ;;  %2187 = vmatpush.msra.mxu2 %v1914_v17  ;;  %v1910_v56 = vld [vmem:[%s4299_s3 + $0x3d8] sm:$0xff]  ;;  %v1066_v23 = vadd.f32 %v3656_v3, %v883_v12  ;;  %v3763_v13 = vpop.f32.mrf.mxu3  ;;  %v1927_v12 = vld [vmem:[%s4299_s3 + $0x460] sm:$0xff]  ;;  %v3789_v18 = vpop.f32.mrf.mxu1 }
 0x192   :  { %v1930_v21 = vld [vmem:[%s4299_s3 + $0x478] sm:$0xff] }
 0x193   :  { %v1662_v19 = vadd.f32 %v2706_v2, %v1613_v5  ;;  %2172 = vmatpush.msra.mxu1 %v1893_v35  ;;  %2188 = vmatpush.msra.mxu2 %v1913_v59  ;;  %v1929_v59 = vld [vmem:[%s4299_s3 + $0x470] sm:$0xff]  ;;  %v1888_v5 = vld [vmem:[%s4299_s3 + $0x328] sm:$0xff]  ;;  %v1249_v3 = vadd.f32 %v3662_v24, %v1066_v23 }
 0x194   :  { %v1925_v23 = vld [vmem:[%s4299_s3 + $0x450] sm:$0xff] }
 0x195   :  { %vm1663_vm4 = vcmp.ge.f32.partialorder %v1662_v19, 0.0  ;;  %v1664_v27 = vmul.f32 0.2, %v1662_v19  ;;  %2173 = vmatpush.msra.mxu1 %v1892_v37  ;;  %2189 = vmatpush.msra.mxu2 %v1912_v45  ;;  %v1908_v37 = vld [vmem:[%s4299_s3 + $0x3c8] sm:$0xff] }
 0x197   :  { %v1665_v17 = vsel %vm1663_vm4, %v1662_v19, %v1664_v27  ;;  %2174 = vmatpush.msra.mxu1 %v1891_v63  ;;  %2190 = vmatpush.msra.mxu2 %v1911_v25  ;;  %v1887_v19 = vld [vmem:[%s4299_s3 + $0x320] sm:$0xff]  ;;  %v884_v25 = vadd.f32 %v3279_v20, %v3096_v16  ;;  %v1906_v16 = vld [vmem:[%s4299_s3 + $0x3b8] sm:$0xff]  ;;  %v1432_v20 = vadd.f32 %v3670_v15, %v1249_v3  ;;  %v1885_v15 = vld [vmem:[%s4299_s3 + $0x310] sm:$0xff]  ;;  %vm2405_vm4 = vcmask 57344  }
 0x198   :  { %v1556_v2 = vpop.f32.mrf.mxu0  ;;  %2103 = vmatmul.f32.vlgmr.msra.gmra.mxu3 %v1665_v17  ;;  %v1907_v63 = vld [vmem:[%s4299_s3 + $0x3c0] sm:$0xff]  ;;  %v3804_v17 = vpop.f32.mrf.mxu2 }
 0x199   :  { %v1614_v35 = vadd.f32 %v1556_v2, %v1431_v9  ;;  %2175 = vmatpush.msra.mxu1 %v1890_v42  ;;  %2191 = vmatpush.msra.mxu2 %v1910_v56  ;;  %v1987_v27 = vld [vmem:[%s4299_s3 + $0x640] sm:$0xff]  ;;  %v1886_v42 = vld [vmem:[%s4299_s3 + $0x318] sm:$0xff]  ;;  %v1905_v2 = vld [vmem:[%s4299_s3 + $0x3b0] sm:$0xff]  ;;  %v3826_v3 = vpop.f32.mrf.mxu3 }
 0x19a   :  { %2207 = vmatpush.msra.mxu3 %v1930_v21  ;;  %2294 = vmatpush.msrb.mxu0 %v1987_v27  ;;  %v2708_v56 = vld [vmem:[%s4298_s1 + $0x4] ss:$0 sm:$0xff]  ;;  %v1922_v27 = vld [vmem:[%s4299_s3 + $0x438] sm:$0xff] }
 0x19b   :  { %v1670_v45 = vadd.f32 %v2707_v7, %v1614_v35  ;;  %2176 = vmatpush.msra.mxu1 %v1889_v6  ;;  %2192 = vmatpush.msra.mxu2 %v1909_v1  ;;  %v1926_v7 = vld [vmem:[%s4299_s3 + $0x458] sm:$0xff]  ;;  %v1067_v6 = vadd.f32 %v3683_v62, %v884_v25  ;;  %v1884_v35 = vld [vmem:[%s4299_s3 + $0x308] sm:$0xff] }
 0x19c   :  { %2208 = vmatpush.msra.mxu3 %v1929_v59  ;;  %v1904_v59 = vld [vmem:[%s4299_s3 + $0x3a8] sm:$0xff]  ;;  %v1946_v25 = vld [vmem:[%s4299_s3 + $0x4f8] sm:$0xff] }
 0x19d   :  { %vm1671_vm5 = vcmp.ge.f32.partialorder %v1670_v45, 0.0  ;;  %v1672_v24 = vmul.f32 0.2, %v1670_v45  ;;  %2177 = vmatpush.msra.mxu1 %v1888_v5  ;;  %2193 = vmatpush.msra.mxu2 %v1908_v37  ;;  %v1250_v5 = vadd.f32 %v3689_v10, %v1067_v6  ;;  %v1924_v62 = vld [vmem:[%s4299_s3 + $0x448] sm:$0xff]  ;;  %v885_v10 = vadd.f32 %v3292_v8, %v3106_v31  ;;  %v2709_v31 = vld [vmem:[%s4298_s1 + $0x5] ss:$0 sm:$0xff] }
 0x19e   :  { %2209 = vmatpush.msra.mxu3 %v1928_v52  ;;  %v1903_v52 = vld [vmem:[%s4299_s3 + $0x3a0] sm:$0xff]  ;;  %v1900_v6 = vld [vmem:[%s4299_s3 + $0x388] sm:$0xff] }
 0x19f   :  { %v1673_v9 = vsel %vm1671_vm5, %v1670_v45, %v1672_v24  ;;  %2178 = vmatpush.msra.mxu1 %v1887_v19  ;;  %2194 = vmatpush.msra.mxu2 %v1907_v63  ;;  %v1883_v45 = vld [vmem:[%s4299_s3 + $0x300] sm:$0xff]  ;;  %v1902_v24 = vld [vmem:[%s4299_s3 + $0x398] sm:$0xff] }
 0x1a0   :  { %v1559_v21 = vpop.f32.mrf.mxu0  ;;  %2123 = vmatmul.f32.vlgmr.msrb.gmra.mxu1 %v1673_v9  ;;  %2210 = vmatpush.msra.mxu3 %v1927_v12  ;;  %v1923_v63 = vld [vmem:[%s4299_s3 + $0x440] sm:$0xff]  ;;  %v1433_v12 = vadd.f32 %v3709_v36, %v1250_v5  ;;  %v1945_v36 = vld [vmem:[%s4299_s3 + $0x4f0] sm:$0xff]  ;;  %v1068_v9 = vadd.f32 %v3725_v32, %v885_v10  ;;  %v338_v5 = vadd.f32 %v3118_v41, %v3116_v40  ;;  %v1942_v40 = vld [vmem:[%s4299_s3 + $0x4d8] sm:$0xff] }
 0x1a1   :  { %v1615_v1 = vadd.f32 %v1559_v21, %v1432_v20  ;;  %2179 = vmatpush.msra.mxu1 %v1886_v42  ;;  %2195 = vmatpush.msra.mxu2 %v1906_v16  ;;  %v1986_v42 = vld [vmem:[%s4299_s3 + $0x638] sm:$0xff]  ;;  %v3855_v16 = vpop.f32.mrf.mxu1  ;;  %v1921_v21 = vld [vmem:[%s4299_s3 + $0x430] sm:$0xff] }
 0x1a2   :  { %2211 = vmatpush.msra.mxu3 %v1926_v7  ;;  %2295 = vmatpush.msrb.mxu0 %v1986_v42  ;;  %v1251_v32 = vadd.f32 %v3738_v11, %v1068_v9  ;;  %v886_v11 = vadd.f32 %v3305_v14, %v3120_v43  ;;  %v521_v41 = vadd.f32 %v3130_v44, %v338_v5  ;;  %v2710_v14 = vld [vmem:[%s4298_s1 + $0x6] ss:$0 sm:$0xff]  ;;  %v1918_v44 = vld [vmem:[%s4299_s3 + $0x418] sm:$0xff]  ;;  %v1940_v42 = vld [vmem:[%s4299_s3 + $0x4c8] sm:$0xff] }
 0x1a3   :  { %v1678_v37 = vadd.f32 %v2708_v56, %v1615_v1  ;;  %2180 = vmatpush.msra.mxu1 %v1885_v15  ;;  %2196 = vmatpush.msra.mxu2 %v1905_v2  ;;  %v1901_v56 = vld [vmem:[%s4299_s3 + $0x390] sm:$0xff]  ;;  %v3867_v15 = vpop.f32.mrf.mxu2  ;;  %v1944_v2 = vld [vmem:[%s4299_s3 + $0x4e8] sm:$0xff] }
 0x1a4   :  { %2212 = vmatpush.msra.mxu3 %v1925_v23  ;;  %v1920_v23 = vld [vmem:[%s4299_s3 + $0x428] sm:$0xff]  ;;  %v1434_v43 = vadd.f32 %v3763_v13, %v1251_v32  ;;  %v1941_v13 = vld [vmem:[%s4299_s3 + $0x4d0] sm:$0xff] }
 0x1a5   :  { %vm1679_vm6 = vcmp.ge.f32.partialorder %v1678_v37, 0.0  ;;  %v1680_v19 = vmul.f32 0.2, %v1678_v37  ;;  %2181 = vmatpush.msra.mxu1 %v1884_v35  ;;  %2197 = vmatpush.msra.mxu2 %v1904_v59  ;;  %v1943_v35 = vld [vmem:[%s4299_s3 + $0x4e0] sm:$0xff]  ;;  %v1984_v32 = vld [vmem:[%s4299_s3 + $0x628] sm:$0xff]  ;;  %v1957_v5 = vld [vmem:[%s4299_s3 + $0x550] sm:$0xff] }
 0x1a6   :  { %2213 = vmatpush.msra.mxu3 %v1924_v62  ;;  %v1899_v59 = vld [vmem:[%s4299_s3 + $0x380] sm:$0xff]  ;;  %v1962_v62 = vld [vmem:[%s4299_s3 + $0x578] sm:$0xff] }
 0x1a7   :  { %v1681_v8 = vsel %vm1679_vm6, %v1678_v37, %v1680_v19  ;;  %2182 = vmatpush.msra.mxu1 %v1883_v45  ;;  %2198 = vmatpush.msra.mxu2 %v1903_v52  ;;  %v3892_v45 = vpop.f32.mrf.mxu3  ;;  %v1919_v52 = vld [vmem:[%s4299_s3 + $0x420] sm:$0xff]  ;;  %v1961_v19 = vld [vmem:[%s4299_s3 + $0x570] sm:$0xff] }
 0x1a8   :  { %v1562_v20 = vpop.f32.mrf.mxu0  ;;  %2143 = vmatmul.f32.vlgmr.msrb.gmra.mxu2 %v1681_v8  ;;  %2214 = vmatpush.msra.mxu3 %v1923_v63  ;;  %v1985_v63 = vld [vmem:[%s4299_s3 + $0x630] sm:$0xff] }
 0x1a9   :  { %v1616_v7 = vadd.f32 %v1562_v20, %v1433_v12  ;;  %2227 = vmatpush.msrb.mxu1 %v1946_v25  ;;  %2199 = vmatpush.msra.mxu2 %v1902_v24  ;;  %v1069_v24 = vadd.f32 %v3789_v18, %v886_v11  ;;  %v3921_v8 = vpop.f32.mrf.mxu1  ;;  %v704_v18 = vadd.f32 %v3136_v48, %v521_v41  ;;  %v1939_v48 = vld [vmem:[%s4299_s3 + $0x4c0] sm:$0xff]  ;;  %v1936_v41 = vld [vmem:[%s4299_s3 + $0x4a8] sm:$0xff] }
 0x1aa   :  { %2215 = vmatpush.msra.mxu3 %v1922_v27  ;;  %v1917_v27 = vld [vmem:[%s4299_s3 + $0x410] sm:$0xff]  ;;  %2296 = vmatpush.msrb.mxu0 %v1985_v63 }
 0x1ab   :  { %v1686_v1 = vadd.f32 %v2709_v31, %v1616_v7  ;;  %2228 = vmatpush.msrb.mxu1 %v1945_v36  ;;  %2200 = vmatpush.msra.mxu2 %v1901_v56  ;;  %v1960_v31 = vld [vmem:[%s4299_s3 + $0x568] sm:$0xff]  ;;  %v1252_v20 = vadd.f32 %v3804_v17, %v1069_v24  ;;  %v1959_v56 = vld [vmem:[%s4299_s3 + $0x560] sm:$0xff]  ;;  %v3934_v9 = vpop.f32.mrf.mxu2  ;;  %v339_v17 = vadd.f32 %v3134_v47, %v3132_v46  ;;  %v1938_v46 = vld [vmem:[%s4299_s3 + $0x4b8] sm:$0xff] }
 0x1ac   :  { %2216 = vmatpush.msra.mxu3 %v1921_v21  ;;  %v1916_v7 = vld [vmem:[%s4299_s3 + $0x408] sm:$0xff]  ;;  %v887_v21 = vadd.f32 %v3327_v38, %v704_v18  ;;  %2297 = vmatpush.msrb.mxu0 %v1984_v32  ;;  %v1983_v24 = vld [vmem:[%s4299_s3 + $0x620] sm:$0xff]  ;;  %v1974_v18 = vld [vmem:[%s4299_s3 + $0x5d8] sm:$0xff] }
 0x1ad   :  { %vm1687_vm7 = vcmp.ge.f32.partialorder %v1686_v1, 0.0  ;;  %v1688_v37 = vmul.f32 0.2, %v1686_v1  ;;  %2229 = vmatpush.msrb.mxu1 %v1944_v2  ;;  %2201 = vmatpush.msra.mxu2 %v1900_v6  ;;  %v1958_v6 = vld [vmem:[%s4299_s3 + $0x558] sm:$0xff]  ;;  %v522_v47 = vadd.f32 %v3146_v22, %v339_v17  ;;  %v1435_v38 = vadd.f32 %v3826_v3, %v1252_v20  ;;  %v1937_v3 = vld [vmem:[%s4299_s3 + $0x4b0] sm:$0xff] }
 0x1ae   :  { %2217 = vmatpush.msra.mxu3 %v1920_v23  ;;  %v2711_v23 = vld [vmem:[%s4298_s1 + $0x7] ss:$0 sm:$0xff]  ;;  %2298 = vmatpush.msrb.mxu0 %v1983_v24 }
 0x1af   :  { %v1689_v10 = vsel %vm1687_vm7, %v1686_v1, %v1688_v37  ;;  %2230 = vmatpush.msrb.mxu1 %v1943_v35  ;;  %2202 = vmatpush.msra.mxu2 %v1899_v59  ;;  %v1915_v1 = vld [vmem:[%s4299_s3 + $0x400] sm:$0xff]  ;;  %v1978_v59 = vld [vmem:[%s4299_s3 + $0x5f8] sm:$0xff]  ;;  %v3968_v11 = vpop.f32.mrf.mxu3  ;;  %v1070_v37 = vadd.f32 %v3855_v16, %v887_v21  ;;  %v1932_v21 = vld [vmem:[%s4299_s3 + $0x488] sm:$0xff] }
 0x1b0   :  { %v1565_v25 = vpop.f32.mrf.mxu0  ;;  %2163 = vmatmul.f32.vlgmr.msrb.gmra.mxu3 %v1689_v10  ;;  %v1976_v10 = vld [vmem:[%s4299_s3 + $0x5e8] sm:$0xff]  ;;  %v1947_v24 = vld [vmem:[%s4299_s3 + $0x500] sm:$0xff] }
 0x1b1   :  { %2247 = vmatpush.msrb.mxu2 %v1962_v62  ;;  %v1617_v12 = vadd.f32 %v1565_v25, %v1434_v43  ;;  %2218 = vmatpush.msra.mxu3 %v1919_v52  ;;  %v1977_v52 = vld [vmem:[%s4299_s3 + $0x5f0] sm:$0xff]  ;;  %v705_v43 = vadd.f32 %v3152_v50, %v522_v47  ;;  %v1253_v16 = vadd.f32 %v3867_v15, %v1070_v37  ;;  %v3991_v63 = vpop.f32.mrf.mxu1  ;;  %v1935_v50 = vld [vmem:[%s4299_s3 + $0x4a0] sm:$0xff] }
 0x1b2   :  { %2231 = vmatpush.msrb.mxu1 %v1942_v40  ;;  %v1956_v40 = vld [vmem:[%s4299_s3 + $0x548] sm:$0xff]  ;;  %v340_v15 = vadd.f32 %v3150_v49, %v3148_v30  ;;  %v1934_v30 = vld [vmem:[%s4299_s3 + $0x498] sm:$0xff]  ;;  %v1931_v47 = vld [vmem:[%s4299_s3 + $0x480] sm:$0xff] }
 0x1b3   :  { %2248 = vmatpush.msrb.mxu2 %v1961_v19  ;;  %v1694_v36 = vadd.f32 %v2710_v14, %v1617_v12  ;;  %2219 = vmatpush.msra.mxu3 %v1918_v44  ;;  %v1955_v19 = vld [vmem:[%s4299_s3 + $0x540] sm:$0xff]  ;;  %v888_v25 = vadd.f32 %v3352_v34, %v705_v43  ;;  %v4005_v12 = vpop.f32.mrf.mxu2  ;;  %v1954_v49 = vld [vmem:[%s4299_s3 + $0x538] sm:$0xff] }
 0x1b4   :  { %2232 = vmatpush.msrb.mxu1 %v1941_v13  ;;  %v1975_v13 = vld [vmem:[%s4299_s3 + $0x5e0] sm:$0xff]  ;;  %v523_v34 = vadd.f32 %v3162_v51, %v340_v15  ;;  %v1933_v51 = vld [vmem:[%s4299_s3 + $0x490] sm:$0xff] }
 0x1b5   :  { %2249 = vmatpush.msrb.mxu2 %v1960_v31  ;;  %vm1695_vm8 = vcmp.ge.f32.partialorder %v1694_v36, 0.0  ;;  %v1696_v2 = vmul.f32 0.2, %v1694_v36  ;;  %2220 = vmatpush.msra.mxu3 %v1917_v27  ;;  %v1436_v31 = vadd.f32 %v3892_v45, %v1253_v16  ;;  %v2712_v27 = vld [vmem:[%s4298_s1 + $0x8] ss:$0 sm:$0xff]  ;;  %v1953_v45 = vld [vmem:[%s4299_s3 + $0x530] sm:$0xff] }
 0x1b6   :  { %2233 = vmatpush.msrb.mxu1 %v1940_v42 }
 0x1b7   :  { %2250 = vmatpush.msrb.mxu2 %v1959_v56  ;;  %v1697_v35 = vsel %vm1695_vm8, %v1694_v36, %v1696_v2  ;;  %2221 = vmatpush.msra.mxu3 %v1916_v7  ;;  %v1071_v36 = vadd.f32 %v3921_v8, %v888_v25  ;;  %v1973_v7 = vld [vmem:[%s4299_s3 + $0x5d0] sm:$0xff]  ;;  %v4034_v17 = vpop.f32.mrf.mxu3  ;;  %v1952_v8 = vld [vmem:[%s4299_s3 + $0x528] sm:$0xff]  ;;  %v706_v2 = vadd.f32 %v3168_v55, %v523_v34  ;;  %v1951_v55 = vld [vmem:[%s4299_s3 + $0x520] sm:$0xff] }
 0x1b8   :  { %2234 = vmatpush.msrb.mxu1 %v1939_v48  ;;  %v1568_v22 = vpop.f32.mrf.mxu0  ;;  %v1982_v48 = vld [vmem:[%s4299_s3 + $0x618] sm:$0xff]  ;;  %v2007_v25 = vld [vmem:[%s4299_s3 + $0x6e0] sm:$0xff] }
 0x1b9   :  { %2183 = vmatmul.f32.vlgmr.msra.gmra.mxu1 %v1697_v35  ;;  %2251 = vmatpush.msrb.mxu2 %v1958_v6  ;;  %v1618_v62 = vadd.f32 %v1568_v22, %v1435_v38  ;;  %v1254_v6 = vadd.f32 %v3934_v9, %v1071_v36  ;;  %v341_v9 = vadd.f32 %v3166_v54, %v3164_v53  ;;  %v2010_v35 = vld [vmem:[%s4299_s3 + $0x6f8] sm:$0xff]  ;;  %v1971_v53 = vld [vmem:[%s4299_s3 + $0x5c0] sm:$0xff] }
 0x1ba   :  { %2222 = vmatpush.msra.mxu3 %v1915_v1  ;;  %2235 = vmatpush.msrb.mxu1 %v1938_v46  ;;  %v1972_v1 = vld [vmem:[%s4299_s3 + $0x5c8] sm:$0xff]  ;;  %v1981_v46 = vld [vmem:[%s4299_s3 + $0x610] sm:$0xff]  ;;  %v889_v38 = vadd.f32 %v3386_v29, %v706_v2  ;;  %v1950_v54 = vld [vmem:[%s4299_s3 + $0x518] sm:$0xff] }
 0x1bb   :  { %2252 = vmatpush.msrb.mxu2 %v1957_v5  ;;  %v1702_v14 = vadd.f32 %v2711_v23, %v1618_v62  ;;  %2299 = vmatpush.msrb.mxu0 %v1982_v48  ;;  %v1031_v5 = vpop.f32.mrf.mxu1  ;;  %v524_v29 = vadd.f32 %v3183_v57, %v341_v9  ;;  %v1437_v22 = vadd.f32 %v3968_v11, %v1254_v6  ;;  %v2009_v62 = vld [vmem:[%s4299_s3 + $0x6f0] sm:$0xff]  ;;  %v1970_v57 = vld [vmem:[%s4299_s3 + $0x5b8] sm:$0xff]  ;;  %v1967_v34 = vld [vmem:[%s4299_s3 + $0x5a0] sm:$0xff] }
 0x1bc   :  { %2267 = vmatpush.msrb.mxu3 %v1978_v59  ;;  %2236 = vmatpush.msrb.mxu1 %v1937_v3  ;;  %v1980_v59 = vld [vmem:[%s4299_s3 + $0x608] sm:$0xff]  ;;  %v1949_v11 = vld [vmem:[%s4299_s3 + $0x510] sm:$0xff]  ;;  %v1072_v43 = vadd.f32 %v3991_v63, %v889_v38  ;;  %v2023_v6 = vld [vmem:[%s4299_s3 + $0x760] sm:$0xff] }
 0x1bd   :  { %2253 = vmatpush.msrb.mxu2 %v1956_v40  ;;  %vm1703_vm9 = vcmp.ge.f32.partialorder %v1702_v14, 0.0  ;;  %v1704_v44 = vmul.f32 0.2, %v1702_v14  ;;  %2300 = vmatpush.msrb.mxu0 %v1981_v46  ;;  %v2713_v3 = vld [vmem:[%s4298_s1 + $0x9] ss:$0 sm:$0xff]  ;;  %v1214_v40 = vpop.f32.mrf.mxu2  ;;  %v1965_v48 = vld [vmem:[%s4299_s3 + $0x590] sm:$0xff] }
 0x1be   :  { %2268 = vmatpush.msrb.mxu3 %v1977_v52  ;;  %2237 = vmatpush.msrb.mxu1 %v1936_v41  ;;  %v1979_v52 = vld [vmem:[%s4299_s3 + $0x600] sm:$0xff]  ;;  %v1255_v63 = vadd.f32 %v4005_v12, %v1072_v43  ;;  %v2002_v9 = vld [vmem:[%s4299_s3 + $0x6b8] sm:$0xff] }
 0x1bf   :  { %2254 = vmatpush.msrb.mxu2 %v1955_v19  ;;  %v1705_v42 = vsel %vm1703_vm9, %v1702_v14, %v1704_v44  ;;  %2301 = vmatpush.msrb.mxu0 %v1980_v59  ;;  %v2008_v14 = vld [vmem:[%s4299_s3 + $0x6e8] sm:$0xff]  ;;  %v1397_v44 = vpop.f32.mrf.mxu3  ;;  %v2042_v59 = vld [vmem:[%s4299_s3 + $0x7f8] sm:$0xff]  ;;  %v1999_v43 = vld [vmem:[%s4299_s3 + $0x6a0] sm:$0xff] }
 0x1c0   :  { %2269 = vmatpush.msrb.mxu3 %v1976_v10  ;;  %2238 = vmatpush.msrb.mxu1 %v1935_v50  ;;  %v1571_v20 = vpop.f32.mrf.mxu0  ;;  %v1969_v10 = vld [vmem:[%s4299_s3 + $0x5b0] sm:$0xff]  ;;  %v1948_v19 = vld [vmem:[%s4299_s3 + $0x508] sm:$0xff]  ;;  %v707_v50 = vadd.f32 %v3189_v61, %v524_v29  ;;  %v342_v61 = vadd.f32 %v3187_v60, %v3185_v58  ;;  %v1438_v60 = vadd.f32 %v4034_v17, %v1255_v63 }
 0x1c1   :  { %2203 = vmatmul.f32.vlgmr.msra.gmra.mxu2 %v1705_v42  ;;  %v1619_v56 = vadd.f32 %v1571_v20, %v1436_v31  ;;  %2302 = vmatpush.msrb.mxu0 %v1979_v52  ;;  %v2006_v31 = vld [vmem:[%s4299_s3 + $0x6d8] sm:$0xff]  ;;  %v2025_v42 = vld [vmem:[%s4299_s3 + $0x770] sm:$0xff]  ;;  %v2004_v17 = vld [vmem:[%s4299_s3 + $0x6c8] sm:$0xff] }
 0x1c2   :  { %2270 = vmatpush.msrb.mxu3 %v1975_v13  ;;  %2239 = vmatpush.msrb.mxu1 %v1934_v30  ;;  %v1968_v13 = vld [vmem:[%s4299_s3 + $0x5a8] sm:$0xff]  ;;  %v890_v12 = vadd.f32 %v3431_v33, %v707_v50  ;;  %v525_v58 = vadd.f32 %v3203_v0, %v342_v61  ;;  %v1966_v0 = vld [vmem:[%s4299_s3 + $0x598] sm:$0xff]  ;;  %v1997_v61 = vld [vmem:[%s4299_s3 + $0x690] sm:$0xff] }
 0x1c3   :  { %2255 = vmatpush.msrb.mxu2 %v1954_v49  ;;  %v1710_v32 = vadd.f32 %v2712_v27, %v1619_v56  ;;  %v2026_v49 = vld [vmem:[%s4299_s3 + $0x778] sm:$0xff]  ;;  %v2714_v33 = vld [vmem:[%s4298_s1 + $0xa] ss:$0 sm:$0xff]  ;;  %v2716_v63 = vld [vmem:[%s4298_s1 + $0xc] ss:$0 sm:$0xff] }
 0x1c4   :  { %2271 = vmatpush.msrb.mxu3 %v1974_v18  ;;  %2240 = vmatpush.msrb.mxu1 %v1933_v51  ;;  %v1034_v18 = vpop.f32.mrf.mxu1  ;;  %v2005_v51 = vld [vmem:[%s4299_s3 + $0x6d0] sm:$0xff]  ;;  %v2024_v56 = vld [vmem:[%s4299_s3 + $0x768] sm:$0xff] }
 0x1c5   :  { %2256 = vmatpush.msrb.mxu2 %v1953_v45  ;;  %vm1711_vm10 = vcmp.ge.f32.partialorder %v1710_v32, 0.0  ;;  %v1712_v23 = vmul.f32 0.2, %v1710_v32  ;;  %v1073_v45 = vadd.f32 %v1031_v5, %v890_v12 }
 0x1c6   :  { %2272 = vmatpush.msrb.mxu3 %v1973_v7  ;;  %2241 = vmatpush.msrb.mxu1 %v1932_v21  ;;  %v1217_v7 = vpop.f32.mrf.mxu2  ;;  %v708_v21 = vadd.f32 %v3205_v4, %v525_v58 }
 0x1c7   :  { %2257 = vmatpush.msrb.mxu2 %v1952_v8  ;;  %v1713_v37 = vsel %vm1711_vm10, %v1710_v32, %v1712_v23  ;;  %v1256_v8 = vadd.f32 %v1214_v40, %v1073_v45  ;;  %v1964_v32 = vld [vmem:[%s4299_s3 + $0x588] sm:$0xff] }
 0x1c8   :  { %2273 = vmatpush.msrb.mxu3 %v1972_v1  ;;  %2242 = vmatpush.msrb.mxu1 %v1931_v47  ;;  %v1574_v41 = vpop.f32.mrf.mxu0  ;;  %v2003_v1 = vld [vmem:[%s4299_s3 + $0x6c0] sm:$0xff]  ;;  %v891_v46 = vadd.f32 %v3478_v26, %v708_v21  ;;  %v1400_v47 = vpop.f32.mrf.mxu3  ;;  %v2715_v23 = vld [vmem:[%s4298_s1 + $0xb] ss:$0 sm:$0xff] }
 0x1c9   :  { %2258 = vmatpush.msrb.mxu2 %v1951_v55  ;;  %2223 = vmatmul.f32.vlgmr.msra.gmra.mxu3 %v1713_v37  ;;  %v1620_v16 = vadd.f32 %v1574_v41, %v1437_v22  ;;  %v1963_v55 = vld [vmem:[%s4299_s3 + $0x580] sm:$0xff]  ;;  %v1439_v38 = vadd.f32 %v1397_v44, %v1256_v8  ;;  %v2021_v22 = vld [vmem:[%s4299_s3 + $0x750] sm:$0xff]  ;;  %v2020_v41 = vld [vmem:[%s4299_s3 + $0x748] sm:$0xff] }
 0x1ca   :  { %2307 = vmatpush.msra.mxu1 %v2010_v35  ;;  %2274 = vmatpush.msrb.mxu3 %v1971_v53  ;;  %v2022_v35 = vld [vmem:[%s4299_s3 + $0x758] sm:$0xff]  ;;  %v2001_v53 = vld [vmem:[%s4299_s3 + $0x6b0] sm:$0xff]  ;;  %v4305_v21 = vld [vmem:[#allocation5_spill] sm:$0xff] }
 0x1cb   :  { %2259 = vmatpush.msrb.mxu2 %v1950_v54  ;;  %v1718_v15 = vadd.f32 %v2713_v3, %v1620_v16  ;;  %v1074_v54 = vadd.f32 %v1034_v18, %v891_v46  ;;  %v2041_v3 = vld [vmem:[%s4299_s3 + $0x7f0] sm:$0xff] }
 0x1cc   :  { %2308 = vmatpush.msra.mxu1 %v2009_v62  ;;  %2275 = vmatpush.msrb.mxu3 %v1970_v57  ;;  %v1037_v37 = vpop.f32.mrf.mxu1  ;;  %v2000_v62 = vld [vmem:[%s4299_s3 + $0x6a8] sm:$0xff] }
 0x1cd   :  { %2260 = vmatpush.msrb.mxu2 %v1949_v11  ;;  %vm1719_vm11 = vcmp.ge.f32.partialorder %v1718_v15, 0.0  ;;  %v1720_v30 = vmul.f32 0.2, %v1718_v15  ;;  %v1257_v52 = vadd.f32 %v1217_v7, %v1074_v54  ;;  %v2040_v57 = vld [vmem:[%s4299_s3 + $0x7e8] sm:$0xff]  ;;  %v1075_v12 = vadd.f32 %v1037_v37, %v3531_v39  ;;  %v2014_v7 = vld [vmem:[%s4299_s3 + $0x718] sm:$0xff]  ;;  %v2029_v37 = vld [vmem:[%s4299_s3 + $0x790] sm:$0xff] }
 0x1ce   :  { %2309 = vmatpush.msra.mxu1 %v2008_v14  ;;  %2276 = vmatpush.msrb.mxu3 %v1969_v10  ;;  %v1220_v11 = vpop.f32.mrf.mxu2  ;;  %v2019_v14 = vld [vmem:[%s4299_s3 + $0x740] sm:$0xff]  ;;  %v2016_v39 = vld [vmem:[%s4299_s3 + $0x728] sm:$0xff] }
 0x1cf   :  { %2261 = vmatpush.msrb.mxu2 %v1948_v19  ;;  %v1721_v27 = vsel %vm1719_vm11, %v1718_v15, %v1720_v30  ;;  %v2039_v10 = vld [vmem:[%s4299_s3 + $0x7e0] sm:$0xff]  ;;  %v1998_v19 = vld [vmem:[%s4299_s3 + $0x698] sm:$0xff]  ;;  %v1440_v50 = vadd.f32 %v1400_v47, %v1257_v52  ;;  %v1258_v58 = vadd.f32 %v1220_v11, %v1075_v12  ;;  %v2012_v47 = vld [vmem:[%s4299_s3 + $0x708] sm:$0xff] }
 0x1d0   :  { %2310 = vmatpush.msra.mxu1 %v2007_v25  ;;  %2277 = vmatpush.msrb.mxu3 %v1968_v13  ;;  %v1577_v20 = vpop.f32.mrf.mxu0  ;;  %v2018_v25 = vld [vmem:[%s4299_s3 + $0x738] sm:$0xff]  ;;  %v1403_v44 = vpop.f32.mrf.mxu3 }
 0x1d1   :  { %2262 = vmatpush.msrb.mxu2 %v1947_v24  ;;  %2243 = vmatmul.f32.vlgmr.msrb.gmra.mxu1 %v1721_v27  ;;  %v1621_v36 = vadd.f32 %v1577_v20, %v1438_v60  ;;  %v2038_v24 = vld [vmem:[%s4299_s3 + $0x7d8] sm:$0xff]  ;;  %v2036_v27 = vld [vmem:[%s4299_s3 + $0x7c8] sm:$0xff]  ;;  %v2015_v20 = vld [vmem:[%s4299_s3 + $0x720] sm:$0xff]  ;;  %v1441_v45 = vadd.f32 %v1403_v44, %v1258_v58 }
 0x1d2   :  { %2278 = vmatpush.msrb.mxu3 %v1967_v34  ;;  %2311 = vmatpush.msra.mxu1 %v2006_v31  ;;  %v2037_v34 = vld [vmem:[%s4299_s3 + $0x7d0] sm:$0xff]  ;;  %v1996_v31 = vld [vmem:[%s4299_s3 + $0x688] sm:$0xff] }
 0x1d3   :  { %2327 = vmatpush.msra.mxu2 %v2026_v49  ;;  %v1726_v2 = vadd.f32 %v2714_v33, %v1621_v36  ;;  %v2017_v49 = vld [vmem:[%s4299_s3 + $0x730] sm:$0xff]  ;;  %v2717_v36 = vld [vmem:[%s4298_s1 + $0xd] ss:$0 sm:$0xff] }
 0x1d4   :  { %2279 = vmatpush.msrb.mxu3 %v1966_v0  ;;  %2312 = vmatpush.msra.mxu1 %v2005_v51  ;;  %v1040_v33 = vpop.f32.mrf.mxu1  ;;  %v2035_v51 = vld [vmem:[%s4299_s3 + $0x7c0] sm:$0xff] }
 0x1d5   :  { %2328 = vmatpush.msra.mxu2 %v2025_v42  ;;  %vm1727_vm12 = vcmp.ge.f32.partialorder %v1726_v2, 0.0  ;;  %v1728_v4 = vmul.f32 0.2, %v1726_v2  ;;  %v1995_v42 = vld [vmem:[%s4299_s3 + $0x680] sm:$0xff]  ;;  %v1076_v8 = vadd.f32 %v1040_v33, %v4305_v21  ;;  %v12_v33 = vstv %s4301_s6 }
 0x1d6   :  { %2280 = vmatpush.msrb.mxu3 %v1965_v48  ;;  %2313 = vmatpush.msra.mxu1 %v2004_v17  ;;  %v1223_v0 = vpop.f32.mrf.mxu2  ;;  %v2034_v17 = vld [vmem:[%s4299_s3 + $0x7b8] sm:$0xff]  ;;  %13 = vst [vmem:[#allocation4] sm:$0x1] %v12_v33 }
 0x1d7   :  { %2329 = vmatpush.msra.mxu2 %v2024_v56  ;;  %v1729_v26 = vsel %vm1727_vm12, %v1726_v2, %v1728_v4  ;;  %v1259_v46 = vadd.f32 %v1223_v0, %v1076_v8 }
 0x1d8   :  { %2281 = vmatpush.msrb.mxu3 %v1964_v32  ;;  %2314 = vmatpush.msra.mxu1 %v2003_v1  ;;  %v1580_v5 = vpop.f32.mrf.mxu0  ;;  %v1406_v32 = vpop.f32.mrf.mxu3  ;;  %v2033_v1 = vld [vmem:[%s4299_s3 + $0x7b0] sm:$0xff] }
 0x1d9   :  { %2330 = vmatpush.msra.mxu2 %v2023_v6  ;;  %v1622_v29 = vadd.f32 %v1580_v5, %v1439_v38  ;;  %v2013_v6 = vld [vmem:[%s4299_s3 + $0x710] sm:$0xff]  ;;  %v2011_v38 = vld [vmem:[%s4299_s3 + $0x700] sm:$0xff] }
 0x1da   :  { %2263 = vmatmul.f32.vlgmr.msrb.gmra.mxu2 %v1729_v26  ;;  %2282 = vmatpush.msrb.mxu3 %v1963_v55  ;;  %v2032_v55 = vld [vmem:[%s4299_s3 + $0x7a8] sm:$0xff]  ;;  %v2031_v26 = vld [vmem:[%s4299_s3 + $0x7a0] sm:$0xff] }
 0x1db   :  { %2315 = vmatpush.msra.mxu1 %v2002_v9  ;;  %2331 = vmatpush.msra.mxu2 %v2022_v35  ;;  %v1734_v40 = vadd.f32 %v2715_v23, %v1622_v29  ;;  %v1442_v35 = vadd.f32 %v1406_v32, %v1259_v46  ;;  %v2030_v29 = vld [vmem:[%s4299_s3 + $0x798] sm:$0xff] }
 0x1dc   :  { %2347 = vmatpush.msra.mxu3 %v2042_v59  ;;  %v1043_v23 = vpop.f32.mrf.mxu1  ;;  %v2718_v59 = vld [vmem:[%s4298_s1 + $0xe] ss:$0 sm:$0xff] }
 0x1dd   :  { %2316 = vmatpush.msra.mxu1 %v2001_v53  ;;  %2332 = vmatpush.msra.mxu2 %v2021_v22  ;;  %vm1735_vm13 = vcmp.ge.f32.partialorder %v1734_v40, 0.0  ;;  %v1736_v16 = vmul.f32 0.2, %v1734_v40  ;;  %v1077_v22 = vadd.f32 %v1043_v23, %v3626_v28  ;;  %v2027_v28 = vld [vmem:[%s4299_s3 + $0x780] sm:$0xff] }
 0x1de   :  { %2348 = vmatpush.msra.mxu3 %v2041_v3  ;;  %v1226_v53 = vpop.f32.mrf.mxu2 }
 0x1df   :  { %2317 = vmatpush.msra.mxu1 %v2000_v62  ;;  %2333 = vmatpush.msra.mxu2 %v2020_v41  ;;  %v1737_v15 = vsel %vm1735_vm13, %v1734_v40, %v1736_v16  ;;  %v1260_v62 = vadd.f32 %v1226_v53, %v1077_v22  ;;  %v2028_v41 = vld [vmem:[%s4299_s3 + $0x788] sm:$0xff] }
 0x1e0   :  { %2349 = vmatpush.msra.mxu3 %v2040_v57  ;;  %v1583_v13 = vpop.f32.mrf.mxu0  ;;  %v1409_v40 = vpop.f32.mrf.mxu3 }
 0x1e1   :  { %2318 = vmatpush.msra.mxu1 %v1999_v43  ;;  %2283 = vmatmul.f32.vlgmr.msrb.gmra.mxu3 %v1737_v15  ;;  %v1623_v30 = vadd.f32 %v1583_v13, %v1440_v50  ;;  %v1443_v11 = vadd.f32 %v1409_v40, %v1260_v62  ;;  %v2719_v43 = vld [vmem:[%s4298_s1 + $0xf] ss:$0 sm:$0xff]  ;;  %v2720_v15 = vld [vmem:[%s4300_s4] ss:$0 sm:$0xff] }
 0x1e2   :  { %2334 = vmatpush.msra.mxu2 %v2019_v14  ;;  %2350 = vmatpush.msra.mxu3 %v2039_v10 }
 0x1e3   :  { %2319 = vmatpush.msra.mxu1 %v1998_v19  ;;  %v1742_v60 = vadd.f32 %v2716_v63, %v1623_v30 }
 0x1e4   :  { %2335 = vmatpush.msra.mxu2 %v2018_v25  ;;  %2351 = vmatpush.msra.mxu3 %v2038_v24 }
 0x1e5   :  { %2320 = vmatpush.msra.mxu1 %v1997_v61  ;;  %vm1743_vm14 = vcmp.ge.f32.partialorder %v1742_v60, 0.0  ;;  %v1744_v18 = vmul.f32 0.2, %v1742_v60 }
 0x1e6   :  { %2336 = vmatpush.msra.mxu2 %v2017_v49  ;;  %2352 = vmatpush.msra.mxu3 %v2037_v34 }
 0x1e7   :  { %2321 = vmatpush.msra.mxu1 %v1996_v31  ;;  %v1745_v56 = vsel %vm1743_vm14, %v1742_v60, %v1744_v18 }
 0x1e8   :  { %2337 = vmatpush.msra.mxu2 %v2016_v39  ;;  %2353 = vmatpush.msra.mxu3 %v2036_v27  ;;  %v1586_v48 = vpop.f32.mrf.mxu0 }
 0x1e9   :  { %2322 = vmatpush.msra.mxu1 %v1995_v42  ;;  %2303 = vmatmul.f32.vlgmr.msrb.gmra.mxu0 %v1745_v56  ;;  %v1624_v2 = vadd.f32 %v1586_v48, %v1441_v45  ;;  %v2721_v42 = vmov 0  }
 0x1ea   :  { %2338 = vmatpush.msra.mxu2 %v2015_v20  ;;  %2354 = vmatpush.msra.mxu3 %v2035_v51 }
 0x1eb   :  { %v1750_v4 = vadd.f32 %v2717_v36, %v1624_v2  ;;  %2703 = vset.pattern.permute.xlu0 %v2721_v42  ;;  %v2371_v36 = vld [vmem:[#allocation4] sm:$0x1] }
 0x1ec   :  { %2339 = vmatpush.msra.mxu2 %v2014_v7  ;;  %2355 = vmatpush.msra.mxu3 %v2034_v17 }
 0x1ed   :  { %vm1751_vm15 = vcmp.ge.f32.partialorder %v1750_v4, 0.0  ;;  %v1752_v9 = vmul.f32 0.2, %v1750_v4  ;;  %2374 = vperm.xlu0 %2703, %v2371_v36  }
 0x1ee   :  { %2340 = vmatpush.msra.mxu2 %v2013_v6  ;;  %2356 = vmatpush.msra.mxu3 %v2033_v1 }
 0x1ef   :  { %v1753_v5 = vsel %vm1751_vm15, %v1750_v4, %v1752_v9 }
 0x1f0   :  { %2341 = vmatpush.msra.mxu2 %v2012_v47  ;;  %2357 = vmatpush.msra.mxu3 %v2032_v55  ;;  %v1589_v54 = vpop.f32.mrf.mxu0 }
 0x1f1   :  { %2323 = vmatmul.f32.vlgmr.msra.gmra.mxu1 %v1753_v5  ;;  %v1625_v3 = vadd.f32 %v1589_v54, %v1442_v35 }
 0x1f2   :  { %2342 = vmatpush.msra.mxu2 %v2011_v38  ;;  %2358 = vmatpush.msra.mxu3 %v2031_v26  ;;  %v2370_v38 = vld [vmem:[%s4302_s5] sm:$0x1] }
 0x1f3   :  { %v1758_v52 = vadd.f32 %v2718_v59, %v1625_v3 }
 0x1f4   :  { %2359 = vmatpush.msra.mxu3 %v2030_v29 }
 0x1f5   :  { %vm1759_vm0 = vcmp.ge.f32.partialorder %v1758_v52, 0.0  ;;  %v1760_v57 = vmul.f32 0.2, %v1758_v52 }
 0x1f6   :  { %2360 = vmatpush.msra.mxu3 %v2029_v37 }
 0x1f7   :  { %v1761_v16 = vsel %vm1759_vm0, %v1758_v52, %v1760_v57 }
 0x1f8   :  { %2361 = vmatpush.msra.mxu3 %v2028_v41  ;;  %v1592_v14 = vpop.f32.mrf.mxu0  ;;  %2343 = vmatmul.f32.vlgmr.msra.gmra.mxu2 %v1761_v16 }
 0x1f9   :  { %v1626_v10 = vadd.f32 %v1592_v14, %v1443_v11 }
 0x1fa   :  { %2362 = vmatpush.msra.mxu3 %v2027_v28 }
 0x1fb   :  { %v1766_v19 = vadd.f32 %v2719_v43, %v1626_v10 }
 0x1fd   :  { %vm1767_vm1 = vcmp.ge.f32.partialorder %v1766_v19, 0.0  ;;  %v1768_v50 = vmul.f32 0.2, %v1766_v19 }
 0x1ff   :  { %v1769_v63 = vsel %vm1767_vm1, %v1766_v19, %v1768_v50 }
 0x200   :  { %2363 = vmatmul.f32.vlgmr.msra.gmra.mxu3 %v1769_v63 }
 0x205   :  { %v2064_v25 = vpop.f32.mrf.mxu1 }
 0x206   :  { %v2065_v13 = vadd.f32 %v2720_v15, %v2064_v25 }
 0x213   :  { %v2084_v44 = vpop.f32.mrf.mxu2 }
 0x214   :  { %v2085_v61 = vadd.f32 %v2084_v44, %v2065_v13 }
 0x21b   :  { %v2104_v24 = vpop.f32.mrf.mxu3 }
 0x21c   :  { %v2105_v12 = vadd.f32 %v2104_v24, %v2085_v61 }
 0x21d   :  { %v2124_v30 = vpop.f32.mrf.mxu1 }
 0x21e   :  { %v2125_v34 = vadd.f32 %v2124_v30, %v2105_v12 }
 0x22b   :  { %v2144_v49 = vpop.f32.mrf.mxu2 }
 0x22c   :  { %v2145_v58 = vadd.f32 %v2144_v49, %v2125_v34 }
 0x233   :  { %v2164_v31 = vpop.f32.mrf.mxu3 }
 0x234   :  { %v2165_v60 = vadd.f32 %v2164_v31, %v2145_v58 }
 0x236   :  { %v2184_v39 = vpop.f32.mrf.mxu1 }
 0x237   :  { %v2185_v18 = vadd.f32 %v2184_v39, %v2165_v60 }
 0x244   :  { %v2204_v27 = vpop.f32.mrf.mxu2 }
 0x245   :  { %v2205_v0 = vadd.f32 %v2204_v27, %v2185_v18 }
 0x24c   :  { %v2224_v20 = vpop.f32.mrf.mxu3 }
 0x24d   :  { %v2225_v51 = vadd.f32 %v2224_v20, %v2205_v0 }
 0x24e   :  { %v2244_v45 = vpop.f32.mrf.mxu1 }
 0x24f   :  { %v2245_v7 = vadd.f32 %v2244_v45, %v2225_v51 }
 0x25d   :  { %v2264_v56 = vpop.f32.mrf.mxu2 }
 0x25e   :  { %v2265_v17 = vadd.f32 %v2264_v56, %v2245_v7 }
 0x25f   :  { %v2375_v23 = vpop.permute.xlu0 %2374 }
 0x260   :  { %v2377_v26 = vperm.slane %v2375_v23, 0 }
 0x264   :  { %v2284_v48 = vpop.f32.mrf.mxu3 }
 0x265   :  { %v2285_v21 = vadd.f32 %v2284_v48, %v2265_v17 }
 0x266   :  { %v2304_v8 = vpop.f32.mrf.mxu0 }
 0x267   :  { %v2305_v6 = vadd.f32 %v2304_v8, %v2285_v21 }
 0x26e   :  { %v2324_v2 = vpop.f32.mrf.mxu1 }
 0x26f   :  { %v2325_v1 = vadd.f32 %v2324_v2, %v2305_v6 }
 0x27b   :  { %v2344_v32 = vpop.f32.mrf.mxu2 }
 0x27c   :  { %v2345_v46 = vadd.f32 %v2344_v32, %v2325_v1 }
 0x283   :  { %v2364_v4 = vpop.f32.mrf.mxu3 }
 0x284   :  { %v2365_v47 = vadd.f32 %v2364_v4, %v2345_v46 }
 0x286   :  { %vm2367_vm2 = vcmp.ge.f32.partialorder %v2365_v47, 0.0  ;;  %v2368_v55 = vmul.f32 0.2, %v2365_v47 }
 0x288   :  { %v2369_v9 = vsel %vm2367_vm2, %v2365_v47, %v2368_v55 }
 0x289   :  { %2700 = vmatpush.xpose.msk.msra.mxu0 %vm2378_vm3, %v2369_v9 }
 0x28c   :  { %2701 = vmatmul.msk.f32.vlgmr.msra.gmra.mxu0 %vm2378_vm3, %v2370_v38 }
 0x309   :  { %v2402_v35 = vpop.f32.mrf.mxu0 }
 0x30a   :  { %v2403_v59 = vadd.f32 %v2402_v35, %v2377_v26 }
 0x30c   :  { %2406 = vst.msk [vmem:[%s4303_s7] sm:$0x1] %vm2405_vm4, %v2403_v59 }

</bundles_post_ra>
